<compile_context>
chip_gen: v7x
topology: tpu7x:2x2x1
jax: 0.10.0
libtpu: 0.0.40
codegen_flags: <defaults>
</compile_context>

<pallas_src>
import functools

import jax
import jax.numpy as jnp
from jax.experimental import pallas as pl
from jax.experimental.pallas import tpu as pltpu

LN_EPS = 1e-12  # DistilBERT LayerNorm eps


def _layernorm(h, gamma, beta):
    # f32 LayerNorm over the hidden dimension.
    mu = jnp.mean(h, axis=-1, keepdims=True)
    var = jnp.mean((h - mu) ** 2, axis=-1, keepdims=True)
    return (h - mu) * jax.lax.rsqrt(var + LN_EPS) * gamma + beta


# ---------------------------------------------------------------- kernel -----

def encoder_kernel(x_ref, bias_ref, emb_g_ref, emb_b_ref,
                   wq_ref, wk_ref, wv_ref, wo_ref,
                   bq_ref, bk_ref, bv_ref, bo_ref,
                   aln_g_ref, aln_b_ref,
                   w1_ref, b1_ref, w2_ref, b2_ref,
                   fln_g_ref, fln_b_ref,
                   o_ref, h_scratch,
                   *, num_heads, head_dim):
    l = pl.program_id(1)
    n_layers = pl.num_programs(1)

    # ---- layer 0: embedding LayerNorm, residual stream enters VMEM ----------
    @pl.when(l == 0)
    def _():
        x = x_ref[0].astype(jnp.float32)                       # (S, D)
        h_scratch[...] = _layernorm(x, emb_g_ref[...], emb_b_ref[...])

    h = h_scratch[...]                                         # (S, D) f32
    h_bf = h.astype(jnp.bfloat16)
    bias = bias_ref[0]                                         # (1, S) f32
    hd = head_dim
    scale = 1.0 / (hd ** 0.5)

    def attention(q_src_bf):
        # q_src_bf: (Q, D) query rows; keys/values use the full residual h_bf.
        q = (jnp.dot(q_src_bf, wq_ref[0], preferred_element_type=jnp.float32)
             + bq_ref[0]) * scale                               # scale folded in
        k = jnp.dot(h_bf, wk_ref[0], preferred_element_type=jnp.float32) + bk_ref[0]
        v = jnp.dot(h_bf, wv_ref[0], preferred_element_type=jnp.float32) + bv_ref[0]

        # batch heads: (Q/S, D) -> (H, Q/S, hd) via static lane slices + stack
        q3 = jnp.stack([q[:, i * hd:(i + 1) * hd] for i in range(num_heads)],
                       axis=0).astype(jnp.bfloat16)
        k3 = jnp.stack([k[:, i * hd:(i + 1) * hd] for i in range(num_heads)],
                       axis=0).astype(jnp.bfloat16)
        v3 = jnp.stack([v[:, i * hd:(i + 1) * hd] for i in range(num_heads)],
                       axis=0).astype(jnp.bfloat16)

        s = jnp.einsum('hqd,hkd->hqk', q3, k3,
                       preferred_element_type=jnp.float32)      # (H, Q, S)
        s = s + bias[None, :, :]                                # key-padding bias
        m = jnp.max(s, axis=-1, keepdims=True)
        e = jnp.exp(s - m)
        denom = jnp.sum(e, axis=-1, keepdims=True)              # (H, Q, 1)
        ctx3 = jnp.einsum('hqk,hkd->hqd', e.astype(jnp.bfloat16), v3,
                          preferred_element_type=jnp.float32)   # (H, Q, hd)
        ctx3 = ctx3 * pl.reciprocal(denom, approx=True)         # normalize once
        ctx = jnp.concatenate([ctx3[i] for i in range(num_heads)], axis=-1)
        return jnp.dot(ctx.astype(jnp.bfloat16), wo_ref[0],
                       preferred_element_type=jnp.float32) + bo_ref[0]

    def ffn(h1):
        ff = jnp.dot(h1.astype(jnp.bfloat16), w1_ref[0],
                     preferred_element_type=jnp.float32) + b1_ref[0]
        # TODO(synk): DistilBERT uses exact (erf) GELU; tanh approximation used.
        ff = jax.nn.gelu(ff, approximate=True)
        return jnp.dot(ff.astype(jnp.bfloat16), w2_ref[0],
                       preferred_element_type=jnp.float32) + b2_ref[0]

    # ---- all layers except the last: full-sequence transformer block --------
    @pl.when(l < n_layers - 1)
    def _():
        attn_out = attention(h_bf)                              # (S, D)
        h1 = _layernorm(h + attn_out, aln_g_ref[0], aln_b_ref[0])
        h2 = _layernorm(h1 + ffn(h1), fln_g_ref[0], fln_b_ref[0])
        h_scratch[...] = h2                                     # carry to l+1

    # ---- last layer: only the CLS query row is needed downstream ------------
    @pl.when(l == n_layers - 1)
    def _():
        attn_out = attention(h_bf[0:1, :])                      # (1, D)
        h1 = _layernorm(h[0:1, :] + attn_out, aln_g_ref[0], aln_b_ref[0])
        h2 = _layernorm(h1 + ffn(h1), fln_g_ref[0], fln_b_ref[0])
        o_ref[0] = h2.astype(o_ref.dtype)                       # (1, D) -> HBM


# ------------------------------------------------------------- wrappers ------

def _batched_spec(shape):
    nd = len(shape)
    return pl.BlockSpec((1,) + tuple(shape[1:]),
                        lambda b, l, nd=nd: (b,) + (0,) * (nd - 1))


def _layer_spec(shape):
    nd = len(shape)
    return pl.BlockSpec((1,) + tuple(shape[1:]),
                        lambda b, l, nd=nd: (l,) + (0,) * (nd - 1))


def _rep_spec(shape):
    nd = len(shape)
    return pl.BlockSpec(tuple(shape), lambda b, l, nd=nd: (0,) * nd)


def run_encoder(x_emb, bias, params, *, num_heads):
    B, S, D = x_emb.shape
    L = params["wq"].shape[0]
    assert D % num_heads == 0
    head_dim = D // num_heads
    kern = functools.partial(encoder_kernel,
                             num_heads=num_heads, head_dim=head_dim)

    layer_keys = ("wq", "wk", "wv", "wo", "bq", "bk", "bv", "bo",
                  "attn_ln_g", "attn_ln_b", "w1", "b1", "w2", "b2",
                  "ffn_ln_g", "ffn_ln_b")

    in_specs = ([_batched_spec(x_emb.shape),
                 _batched_spec(bias.shape),
                 _rep_spec(params["emb_ln_g"].shape),
                 _rep_spec(params["emb_ln_b"].shape)]
                + [_layer_spec(params[k].shape) for k in layer_keys])

    return pl.pallas_call(
        kern,
        out_shape=jax.ShapeDtypeStruct((B, 1, D), jnp.bfloat16),
        grid=(B, L),
        in_specs=in_specs,
        out_specs=pl.BlockSpec((1, 1, D), lambda b, l: (b, 0, 0)),
        scratch_shapes=[pltpu.VMEM((S, D), jnp.float32)],
        compiler_params=pltpu.CompilerParams(
            dimension_semantics=("parallel", "arbitrary"),
            vmem_limit_bytes=32 * 1024 * 1024),
    )(x_emb, bias, params["emb_ln_g"], params["emb_ln_b"],
      *[params[k] for k in layer_keys])


# ------------------------------------------------------------ parameters -----

def init_params(key, vocab, max_pos, D, F, n_layers):
    ks = list(jax.random.split(key, 2 + 6 * n_layers))

    def w(shape):
        return 0.02 * jax.random.normal(ks.pop(0), shape, jnp.float32)

    p = {
        "word_emb": w((vocab, D)),
        "pos_emb": w((max_pos, D)),
        "emb_ln_g": jnp.ones((1, D), jnp.float32),
        "emb_ln_b": jnp.zeros((1, D), jnp.float32),
    }

    def stack_rand(shape):  # bf16 weights for the MXU
        return jnp.stack([w(shape) for _ in range(n_layers)]).astype(jnp.bfloat16)

    p["wq"] = stack_rand((D, D))
    p["wk"] = stack_rand((D, D))
    p["wv"] = stack_rand((D, D))
    p["wo"] = stack_rand((D, D))
    p["w1"] = stack_rand((D, F))
    p["w2"] = stack_rand((F, D))

    zeros_d = jnp.zeros((n_layers, 1, D), jnp.float32)
    ones_d = jnp.ones((n_layers, 1, D), jnp.float32)
    p["bq"] = zeros_d
    p["bk"] = zeros_d
    p["bv"] = zeros_d
    p["bo"] = zeros_d
    p["attn_ln_g"] = ones_d
    p["attn_ln_b"] = zeros_d
    p["b1"] = jnp.zeros((n_layers, 1, F), jnp.float32)
    p["b2"] = zeros_d
    p["ffn_ln_g"] = ones_d
    p["ffn_ln_b"] = zeros_d
    return p


# ------------------------------------------------------------ forward --------

def text_encoder_forward(params, input_ids, attention_mask, *, num_heads):
    """Equivalent of TextEncoder.forward: DistilBERT forward, return
    last_hidden_state[:, target_token_idx=0, :]."""
    B, S = input_ids.shape
    # embedding gather + position embeddings (glue); LN happens in the kernel
    x = params["word_emb"][input_ids] + params["pos_emb"][:S][None, :, :]
    x = x.astype(jnp.bfloat16)                      # halve activation DMA bytes
    # attention mask -> additive bias (B, 1, S); 0 where valid, -1e9 masked
    bias = (1.0 - attention_mask.astype(jnp.float32))[:, None, :] * -1e9
    cls = run_encoder(x, bias, params, num_heads=num_heads)   # (B, 1, D) bf16
    # dropout (CFG.dropout) is a no-op in eval mode
    return cls[:, 0, :].astype(jnp.float32)


# ------------------------------------------------------------ main -----------

if __name__ == "__main__":
    B, S = 2, 8                  # batch, sequence length
    VOCAB, MAX_POS = 100, 16
    D, H, F, L = 64, 2, 128, 2   # hidden, heads, ffn, layers (small DistilBERT)

    key = jax.random.PRNGKey(0)
    k_param, k_ids = jax.random.split(key)
    params = init_params(k_param, VOCAB, MAX_POS, D, F, L)

    input_ids = jax.random.randint(k_ids, (B, S), 0, VOCAB, dtype=jnp.int32)
    attention_mask = jnp.array(
        [[1, 1, 1, 1, 1, 1, 1, 1],
         [1, 1, 1, 1, 1, 1, 0, 0]], dtype=jnp.int32)

    out = text_encoder_forward(params, input_ids, attention_mask, num_heads=H)
    out = jax.block_until_ready(out)
    assert out.shape == (B, D) and out.dtype == jnp.float32
    assert bool(jnp.all(jnp.isfinite(out)))
    print("KERNEL_OK")
</pallas_src>

<mosaic_0001>
module attributes {stable_mosaic.version = 11 : i64} {
  func.func @encoder_kernel(%arg0: i32, %arg1: i32, %arg2: memref<1x8x64xbf16, #tpu.memory_space<vmem>>, %arg3: memref<1x1x8xf32, #tpu.memory_space<vmem>>, %arg4: memref<1x64xf32, #tpu.memory_space<vmem>>, %arg5: memref<1x64xf32, #tpu.memory_space<vmem>>, %arg6: memref<1x64x64xbf16, #tpu.memory_space<vmem>>, %arg7: memref<1x64x64xbf16, #tpu.memory_space<vmem>>, %arg8: memref<1x64x64xbf16, #tpu.memory_space<vmem>>, %arg9: memref<1x64x64xbf16, #tpu.memory_space<vmem>>, %arg10: memref<1x1x64xf32, #tpu.memory_space<vmem>>, %arg11: memref<1x1x64xf32, #tpu.memory_space<vmem>>, %arg12: memref<1x1x64xf32, #tpu.memory_space<vmem>>, %arg13: memref<1x1x64xf32, #tpu.memory_space<vmem>>, %arg14: memref<1x1x64xf32, #tpu.memory_space<vmem>>, %arg15: memref<1x1x64xf32, #tpu.memory_space<vmem>>, %arg16: memref<1x64x128xbf16, #tpu.memory_space<vmem>>, %arg17: memref<1x1x128xf32, #tpu.memory_space<vmem>>, %arg18: memref<1x128x64xbf16, #tpu.memory_space<vmem>>, %arg19: memref<1x1x64xf32, #tpu.memory_space<vmem>>, %arg20: memref<1x1x64xf32, #tpu.memory_space<vmem>>, %arg21: memref<1x1x64xf32, #tpu.memory_space<vmem>>, %arg22: memref<1x1x64xbf16, #tpu.memory_space<vmem>>, %arg23: memref<8x64xf32, #tpu.memory_space<vmem>>) attributes {dimension_semantics = [#tpu.dimension_semantics<parallel>, #tpu.dimension_semantics<arbitrary>], iteration_bounds = array<i64: 2, 2>, scalar_prefetch = 0 : i64, scratch_operands = 1 : i64, tpu.core_type = #tpu.core_type<tc>, window_params = [{transform_indices = @transform_0, window_bounds = array<i64: 1, 8, 64>}, {transform_indices = @transform_1, window_bounds = array<i64: 1, 1, 8>}, {pipeline_mode = #tpu.pipeline_mode<synchronous>, transform_indices = @transform_2, window_bounds = array<i64: 1, 64>}, {pipeline_mode = #tpu.pipeline_mode<synchronous>, transform_indices = @transform_3, window_bounds = array<i64: 1, 64>}, {transform_indices = @transform_4, window_bounds = array<i64: 1, 64, 64>}, {transform_indices = @transform_5, window_bounds = array<i64: 1, 64, 64>}, {transform_indices = @transform_6, window_bounds = array<i64: 1, 64, 64>}, {transform_indices = @transform_7, window_bounds = array<i64: 1, 64, 64>}, {transform_indices = @transform_8, window_bounds = array<i64: 1, 1, 64>}, {transform_indices = @transform_9, window_bounds = array<i64: 1, 1, 64>}, {transform_indices = @transform_10, window_bounds = array<i64: 1, 1, 64>}, {transform_indices = @transform_11, window_bounds = array<i64: 1, 1, 64>}, {transform_indices = @transform_12, window_bounds = array<i64: 1, 1, 64>}, {transform_indices = @transform_13, window_bounds = array<i64: 1, 1, 64>}, {transform_indices = @transform_14, window_bounds = array<i64: 1, 64, 128>}, {transform_indices = @transform_15, window_bounds = array<i64: 1, 1, 128>}, {transform_indices = @transform_16, window_bounds = array<i64: 1, 128, 64>}, {transform_indices = @transform_17, window_bounds = array<i64: 1, 1, 64>}, {transform_indices = @transform_18, window_bounds = array<i64: 1, 1, 64>}, {transform_indices = @transform_19, window_bounds = array<i64: 1, 1, 64>}, {transform_indices = @transform_20, window_bounds = array<i64: 1, 1, 64>}]} {
    %c0_i32 = arith.constant 0 : i32
    %0 = arith.cmpi eq, %arg1, %c0_i32 : i32
    %1 = arith.extui %0 : i1 to i32
    %c0_i32_0 = arith.constant 0 : i32
    %2 = arith.cmpi ne, %1, %c0_i32_0 : i32
    scf.if %2 {
      %c0_8 = arith.constant 0 : index
      %c0_9 = arith.constant 0 : index
      %c0_10 = arith.constant 0 : index
      %13 = vector.load %arg2[%c0_8, %c0_9, %c0_10] : memref<1x8x64xbf16, #tpu.memory_space<vmem>>, vector<1x8x64xbf16>
      %14 = vector.shape_cast %13 : vector<1x8x64xbf16> to vector<8x64xbf16>
      %15 = arith.extf %14 : vector<8x64xbf16> to vector<8x64xf32>
      %c0_11 = arith.constant 0 : index
      %c0_12 = arith.constant 0 : index
      %16 = vector.load %arg4[%c0_11, %c0_12] : memref<1x64xf32, #tpu.memory_space<vmem>>, vector<1x64xf32>
      %c0_13 = arith.constant 0 : index
      %c0_14 = arith.constant 0 : index
      %17 = vector.load %arg5[%c0_13, %c0_14] : memref<1x64xf32, #tpu.memory_space<vmem>>, vector<1x64xf32>
      %cst = arith.constant dense<0.000000e+00> : vector<8xf32>
      %18 = vector.multi_reduction <add>, %15, %cst [1] : vector<8x64xf32> to vector<8xf32>
      %19 = vector.shape_cast %18 : vector<8xf32> to vector<8x1xf32>
      %cst_15 = arith.constant 6.400000e+01 : f32
      %20 = vector.broadcast %cst_15 : f32 to vector<8x1xf32>
      %21 = arith.divf %19, %20 : vector<8x1xf32>
      %22 = vector.broadcast %21 : vector<8x1xf32> to vector<8x64xf32>
      %23 = arith.subf %15, %22 : vector<8x64xf32>
      %24 = arith.mulf %23, %23 : vector<8x64xf32>
      %cst_16 = arith.constant dense<0.000000e+00> : vector<8xf32>
      %25 = vector.multi_reduction <add>, %24, %cst_16 [1] : vector<8x64xf32> to vector<8xf32>
      %26 = vector.shape_cast %25 : vector<8xf32> to vector<8x1xf32>
      %cst_17 = arith.constant 6.400000e+01 : f32
      %27 = vector.broadcast %cst_17 : f32 to vector<8x1xf32>
      %28 = arith.divf %26, %27 : vector<8x1xf32>
      %29 = vector.broadcast %21 : vector<8x1xf32> to vector<8x64xf32>
      %30 = arith.subf %15, %29 : vector<8x64xf32>
      %cst_18 = arith.constant 9.99999996E-13 : f32
      %31 = vector.broadcast %cst_18 : f32 to vector<8x1xf32>
      %32 = arith.addf %28, %31 : vector<8x1xf32>
      %33 = math.rsqrt %32 : vector<8x1xf32>
      %34 = vector.broadcast %33 : vector<8x1xf32> to vector<8x64xf32>
      %35 = arith.mulf %30, %34 : vector<8x64xf32>
      %36 = vector.broadcast %16 : vector<1x64xf32> to vector<8x64xf32>
      %37 = arith.mulf %35, %36 : vector<8x64xf32>
      %38 = vector.broadcast %17 : vector<1x64xf32> to vector<8x64xf32>
      %39 = arith.addf %37, %38 : vector<8x64xf32>
      %c0_19 = arith.constant 0 : index
      %c0_20 = arith.constant 0 : index
      %40 = vector.load %arg23[%c0_19, %c0_20] : memref<8x64xf32, #tpu.memory_space<vmem>>, vector<8x64xf32>
      tpu.vector_store %arg23[%c0_19, %c0_20], %39 {strides = array<i32>} : memref<8x64xf32, #tpu.memory_space<vmem>>, vector<8x64xf32>,
    } else {
    }
    %c0 = arith.constant 0 : index
    %c0_1 = arith.constant 0 : index
    %3 = vector.load %arg23[%c0, %c0_1] : memref<8x64xf32, #tpu.memory_space<vmem>>, vector<8x64xf32>
    %4 = arith.truncf %3 : vector<8x64xf32> to vector<8x64xbf16>
    %c0_2 = arith.constant 0 : index
    %c0_3 = arith.constant 0 : index
    %c0_4 = arith.constant 0 : index
    %5 = vector.load %arg3[%c0_2, %c0_3, %c0_4] : memref<1x1x8xf32, #tpu.memory_space<vmem>>, vector<1x1x8xf32>
    %6 = vector.shape_cast %5 : vector<1x1x8xf32> to vector<1x8xf32>
    %c1_i32 = arith.constant 1 : i32
    %7 = arith.cmpi slt, %arg1, %c1_i32 : i32
    %8 = arith.extui %7 : i1 to i32
    %c0_i32_5 = arith.constant 0 : i32
    %9 = arith.cmpi ne, %8, %c0_i32_5 : i32
    scf.if %9 {
      %c0_8 = arith.constant 0 : index
      %c0_9 = arith.constant 0 : index
      %c0_10 = arith.constant 0 : index
      %13 = vector.load %arg6[%c0_8, %c0_9, %c0_10] : memref<1x64x64xbf16, #tpu.memory_space<vmem>>, vector<1x64x64xbf16>
      %14 = vector.shape_cast %13 : vector<1x64x64xbf16> to vector<64x64xbf16>
      %cst = arith.constant dense<0.000000e+00> : vector<8x64xf32>
      %15 = tpu.matmul %4, %14, %cst {dimension_numbers = #tpu.dot_dimension_numbers<[1], [0], [0], [1], [0, 0, 1, 1], [], []>} : vector<8x64xbf16>, vector<64x64xbf16>, vector<8x64xf32> -> vector<8x64xf32>
      %c0_11 = arith.constant 0 : index
      %c0_12 = arith.constant 0 : index
      %c0_13 = arith.constant 0 : index
      %16 = vector.load %arg10[%c0_11, %c0_12, %c0_13] : memref<1x1x64xf32, #tpu.memory_space<vmem>>, vector<1x1x64xf32>
      %17 = vector.shape_cast %16 : vector<1x1x64xf32> to vector<1x64xf32>
      %18 = vector.broadcast %17 : vector<1x64xf32> to vector<8x64xf32>
      %19 = arith.addf %15, %18 : vector<8x64xf32>
      %cst_14 = arith.constant 0.176776692 : f32
      %20 = vector.broadcast %cst_14 : f32 to vector<8x64xf32>
      %21 = arith.mulf %19, %20 : vector<8x64xf32>
      %c0_15 = arith.constant 0 : index
      %c0_16 = arith.constant 0 : index
      %c0_17 = arith.constant 0 : index
      %22 = vector.load %arg7[%c0_15, %c0_16, %c0_17] : memref<1x64x64xbf16, #tpu.memory_space<vmem>>, vector<1x64x64xbf16>
      %23 = vector.shape_cast %22 : vector<1x64x64xbf16> to vector<64x64xbf16>
      %cst_18 = arith.constant dense<0.000000e+00> : vector<8x64xf32>
      %24 = tpu.matmul %4, %23, %cst_18 {dimension_numbers = #tpu.dot_dimension_numbers<[1], [0], [0], [1], [0, 0, 1, 1], [], []>} : vector<8x64xbf16>, vector<64x64xbf16>, vector<8x64xf32> -> vector<8x64xf32>
      %c0_19 = arith.constant 0 : index
      %c0_20 = arith.constant 0 : index
      %c0_21 = arith.constant 0 : index
      %25 = vector.load %arg11[%c0_19, %c0_20, %c0_21] : memref<1x1x64xf32, #tpu.memory_space<vmem>>, vector<1x1x64xf32>
      %26 = vector.shape_cast %25 : vector<1x1x64xf32> to vector<1x64xf32>
      %27 = vector.broadcast %26 : vector<1x64xf32> to vector<8x64xf32>
      %28 = arith.addf %24, %27 : vector<8x64xf32>
      %c0_22 = arith.constant 0 : index
      %c0_23 = arith.constant 0 : index
      %c0_24 = arith.constant 0 : index
      %29 = vector.load %arg8[%c0_22, %c0_23, %c0_24] : memref<1x64x64xbf16, #tpu.memory_space<vmem>>, vector<1x64x64xbf16>
      %30 = vector.shape_cast %29 : vector<1x64x64xbf16> to vector<64x64xbf16>
      %cst_25 = arith.constant dense<0.000000e+00> : vector<8x64xf32>
      %31 = tpu.matmul %4, %30, %cst_25 {dimension_numbers = #tpu.dot_dimension_numbers<[1], [0], [0], [1], [0, 0, 1, 1], [], []>} : vector<8x64xbf16>, vector<64x64xbf16>, vector<8x64xf32> -> vector<8x64xf32>
      %c0_26 = arith.constant 0 : index
      %c0_27 = arith.constant 0 : index
      %c0_28 = arith.constant 0 : index
      %32 = vector.load %arg12[%c0_26, %c0_27, %c0_28] : memref<1x1x64xf32, #tpu.memory_space<vmem>>, vector<1x1x64xf32>
      %33 = vector.shape_cast %32 : vector<1x1x64xf32> to vector<1x64xf32>
      %34 = vector.broadcast %33 : vector<1x64xf32> to vector<8x64xf32>
      %35 = arith.addf %31, %34 : vector<8x64xf32>
      %36 = vector.extract_strided_slice %21 {offsets = [0, 0], sizes = [8, 32], strides = [1, 1]} : vector<8x64xf32> to vector<8x32xf32>
      %37 = vector.extract_strided_slice %21 {offsets = [0, 32], sizes = [8, 32], strides = [1, 1]} : vector<8x64xf32> to vector<8x32xf32>
      %38 = vector.shape_cast %36 : vector<8x32xf32> to vector<1x8x32xf32>
      %39 = vector.shape_cast %37 : vector<8x32xf32> to vector<1x8x32xf32>
      %40 = tpu.concatenate %38, %39 in 0 : vector<1x8x32xf32>, vector<1x8x32xf32> -> vector<2x8x32xf32>
      %41 = arith.truncf %40 : vector<2x8x32xf32> to vector<2x8x32xbf16>
      %42 = vector.extract_strided_slice %28 {offsets = [0, 0], sizes = [8, 32], strides = [1, 1]} : vector<8x64xf32> to vector<8x32xf32>
      %43 = vector.extract_strided_slice %28 {offsets = [0, 32], sizes = [8, 32], strides = [1, 1]} : vector<8x64xf32> to vector<8x32xf32>
      %44 = vector.shape_cast %42 : vector<8x32xf32> to vector<1x8x32xf32>
      %45 = vector.shape_cast %43 : vector<8x32xf32> to vector<1x8x32xf32>
      %46 = tpu.concatenate %44, %45 in 0 : vector<1x8x32xf32>, vector<1x8x32xf32> -> vector<2x8x32xf32>
      %47 = arith.truncf %46 : vector<2x8x32xf32> to vector<2x8x32xbf16>
      %48 = vector.extract_strided_slice %35 {offsets = [0, 0], sizes = [8, 32], strides = [1, 1]} : vector<8x64xf32> to vector<8x32xf32>
      %49 = vector.extract_strided_slice %35 {offsets = [0, 32], sizes = [8, 32], strides = [1, 1]} : vector<8x64xf32> to vector<8x32xf32>
      %50 = vector.shape_cast %48 : vector<8x32xf32> to vector<1x8x32xf32>
      %51 = vector.shape_cast %49 : vector<8x32xf32> to vector<1x8x32xf32>
      %52 = tpu.concatenate %50, %51 in 0 : vector<1x8x32xf32>, vector<1x8x32xf32> -> vector<2x8x32xf32>
      %53 = arith.truncf %52 : vector<2x8x32xf32> to vector<2x8x32xbf16>
      "tpu.trace_start"() <{level = 10 : i32, message = "hqd,hkd->hqk"}> : () -> ()
      %cst_29 = arith.constant dense<0.000000e+00> : vector<2x8x8xf32>
      %54 = tpu.matmul %41, %47, %cst_29 {dimension_numbers = #tpu.dot_dimension_numbers<[2], [2], [1], [1], [0, 0, 0, 1, 1, 1], [0], [0]>} : vector<2x8x32xbf16>, vector<2x8x32xbf16>, vector<2x8x8xf32> -> vector<2x8x8xf32>
      "tpu.trace_stop"() : () -> ()
      %55 = vector.shape_cast %6 : vector<1x8xf32> to vector<1x1x8xf32>
      %56 = vector.broadcast %55 : vector<1x1x8xf32> to vector<2x8x8xf32>
      %57 = arith.addf %54, %56 : vector<2x8x8xf32>
      %cst_30 = arith.constant dense<0xFF800000> : vector<2x8xf32>
      %58 = vector.multi_reduction <maximumf>, %57, %cst_30 [2] : vector<2x8x8xf32> to vector<2x8xf32>
      %59 = vector.shape_cast %58 : vector<2x8xf32> to vector<2x8x1xf32>
      %60 = vector.broadcast %59 : vector<2x8x1xf32> to vector<2x8x8xf32>
      %61 = arith.subf %57, %60 : vector<2x8x8xf32>
      %62 = math.exp %61 : vector<2x8x8xf32>
      %cst_31 = arith.constant dense<0.000000e+00> : vector<2x8xf32>
      %63 = vector.multi_reduction <add>, %62, %cst_31 [2] : vector<2x8x8xf32> to vector<2x8xf32>
      %64 = vector.shape_cast %63 : vector<2x8xf32> to vector<2x8x1xf32>
      %65 = arith.truncf %62 : vector<2x8x8xf32> to vector<2x8x8xbf16>
      "tpu.trace_start"() <{level = 10 : i32, message = "hqk,hkd->hqd"}> : () -> ()
      %cst_32 = arith.constant dense<0.000000e+00> : vector<2x8x32xf32>
      %66 = tpu.matmul %65, %53, %cst_32 {dimension_numbers = #tpu.dot_dimension_numbers<[2], [1], [1], [2], [0, 0, 0, 1, 1, 2], [0], [0]>} : vector<2x8x8xbf16>, vector<2x8x32xbf16>, vector<2x8x32xf32> -> vector<2x8x32xf32>
      "tpu.trace_stop"() : () -> ()
      %67 = tpu.reciprocal %64 {approx = true} : vector<2x8x1xf32> -> vector<2x8x1xf32>
      %68 = vector.broadcast %67 : vector<2x8x1xf32> to vector<2x8x32xf32>
      %69 = arith.mulf %66, %68 : vector<2x8x32xf32>
      %70 = vector.extract_strided_slice %69 {offsets = [0, 0, 0], sizes = [1, 8, 32], strides = [1, 1, 1]} : vector<2x8x32xf32> to vector<1x8x32xf32>
      %71 = vector.shape_cast %70 : vector<1x8x32xf32> to vector<8x32xf32>
      %72 = vector.extract_strided_slice %69 {offsets = [1, 0, 0], sizes = [1, 8, 32], strides = [1, 1, 1]} : vector<2x8x32xf32> to vector<1x8x32xf32>
      %73 = vector.shape_cast %72 : vector<1x8x32xf32> to vector<8x32xf32>
      %74 = tpu.concatenate %71, %73 in 1 : vector<8x32xf32>, vector<8x32xf32> -> vector<8x64xf32>
      %75 = arith.truncf %74 : vector<8x64xf32> to vector<8x64xbf16>
      %c0_33 = arith.constant 0 : index
      %c0_34 = arith.constant 0 : index
      %c0_35 = arith.constant 0 : index
      %76 = vector.load %arg9[%c0_33, %c0_34, %c0_35] : memref<1x64x64xbf16, #tpu.memory_space<vmem>>, vector<1x64x64xbf16>
      %77 = vector.shape_cast %76 : vector<1x64x64xbf16> to vector<64x64xbf16>
      %cst_36 = arith.constant dense<0.000000e+00> : vector<8x64xf32>
      %78 = tpu.matmul %75, %77, %cst_36 {dimension_numbers = #tpu.dot_dimension_numbers<[1], [0], [0], [1], [0, 0, 1, 1], [], []>} : vector<8x64xbf16>, vector<64x64xbf16>, vector<8x64xf32> -> vector<8x64xf32>
      %c0_37 = arith.constant 0 : index
      %c0_38 = arith.constant 0 : index
      %c0_39 = arith.constant 0 : index
      %79 = vector.load %arg13[%c0_37, %c0_38, %c0_39] : memref<1x1x64xf32, #tpu.memory_space<vmem>>, vector<1x1x64xf32>
      %80 = vector.shape_cast %79 : vector<1x1x64xf32> to vector<1x64xf32>
      %81 = vector.broadcast %80 : vector<1x64xf32> to vector<8x64xf32>
      %82 = arith.addf %78, %81 : vector<8x64xf32>
      %83 = arith.addf %3, %82 : vector<8x64xf32>
      %c0_40 = arith.constant 0 : index
      %c0_41 = arith.constant 0 : index
      %c0_42 = arith.constant 0 : index
      %84 = vector.load %arg14[%c0_40, %c0_41, %c0_42] : memref<1x1x64xf32, #tpu.memory_space<vmem>>, vector<1x1x64xf32>
      %85 = vector.shape_cast %84 : vector<1x1x64xf32> to vector<1x64xf32>
      %c0_43 = arith.constant 0 : index
      %c0_44 = arith.constant 0 : index
      %c0_45 = arith.constant 0 : index
      %86 = vector.load %arg15[%c0_43, %c0_44, %c0_45] : memref<1x1x64xf32, #tpu.memory_space<vmem>>, vector<1x1x64xf32>
      %87 = vector.shape_cast %86 : vector<1x1x64xf32> to vector<1x64xf32>
      %cst_46 = arith.constant dense<0.000000e+00> : vector<8xf32>
      %88 = vector.multi_reduction <add>, %83, %cst_46 [1] : vector<8x64xf32> to vector<8xf32>
      %89 = vector.shape_cast %88 : vector<8xf32> to vector<8x1xf32>
      %cst_47 = arith.constant 6.400000e+01 : f32
      %90 = vector.broadcast %cst_47 : f32 to vector<8x1xf32>
      %91 = arith.divf %89, %90 : vector<8x1xf32>
      %92 = vector.broadcast %91 : vector<8x1xf32> to vector<8x64xf32>
      %93 = arith.subf %83, %92 : vector<8x64xf32>
      %94 = arith.mulf %93, %93 : vector<8x64xf32>
      %cst_48 = arith.constant dense<0.000000e+00> : vector<8xf32>
      %95 = vector.multi_reduction <add>, %94, %cst_48 [1] : vector<8x64xf32> to vector<8xf32>
      %96 = vector.shape_cast %95 : vector<8xf32> to vector<8x1xf32>
      %cst_49 = arith.constant 6.400000e+01 : f32
      %97 = vector.broadcast %cst_49 : f32 to vector<8x1xf32>
      %98 = arith.divf %96, %97 : vector<8x1xf32>
      %99 = vector.broadcast %91 : vector<8x1xf32> to vector<8x64xf32>
      %100 = arith.subf %83, %99 : vector<8x64xf32>
      %cst_50 = arith.constant 9.99999996E-13 : f32
      %101 = vector.broadcast %cst_50 : f32 to vector<8x1xf32>
      %102 = arith.addf %98, %101 : vector<8x1xf32>
      %103 = math.rsqrt %102 : vector<8x1xf32>
      %104 = vector.broadcast %103 : vector<8x1xf32> to vector<8x64xf32>
      %105 = arith.mulf %100, %104 : vector<8x64xf32>
      %106 = vector.broadcast %85 : vector<1x64xf32> to vector<8x64xf32>
      %107 = arith.mulf %105, %106 : vector<8x64xf32>
      %108 = vector.broadcast %87 : vector<1x64xf32> to vector<8x64xf32>
      %109 = arith.addf %107, %108 : vector<8x64xf32>
      %110 = arith.truncf %109 : vector<8x64xf32> to vector<8x64xbf16>
      %c0_51 = arith.constant 0 : index
      %c0_52 = arith.constant 0 : index
      %c0_53 = arith.constant 0 : index
      %111 = vector.load %arg16[%c0_51, %c0_52, %c0_53] : memref<1x64x128xbf16, #tpu.memory_space<vmem>>, vector<1x64x128xbf16>
      %112 = vector.shape_cast %111 : vector<1x64x128xbf16> to vector<64x128xbf16>
      %cst_54 = arith.constant dense<0.000000e+00> : vector<8x128xf32>
      %113 = tpu.matmul %110, %112, %cst_54 {dimension_numbers = #tpu.dot_dimension_numbers<[1], [0], [0], [1], [0, 0, 1, 1], [], []>} : vector<8x64xbf16>, vector<64x128xbf16>, vector<8x128xf32> -> vector<8x128xf32>
      %c0_55 = arith.constant 0 : index
      %c0_56 = arith.constant 0 : index
      %c0_57 = arith.constant 0 : index
      %114 = vector.load %arg17[%c0_55, %c0_56, %c0_57] : memref<1x1x128xf32, #tpu.memory_space<vmem>>, vector<1x1x128xf32>
      %115 = vector.shape_cast %114 : vector<1x1x128xf32> to vector<1x128xf32>
      %116 = vector.broadcast %115 : vector<1x128xf32> to vector<8x128xf32>
      %117 = arith.addf %113, %116 : vector<8x128xf32>
      %118 = arith.mulf %117, %117 : vector<8x128xf32>
      %119 = arith.mulf %117, %118 : vector<8x128xf32>
      %cst_58 = arith.constant 4.471500e-02 : f32
      %120 = vector.broadcast %cst_58 : f32 to vector<8x128xf32>
      %121 = arith.mulf %120, %119 : vector<8x128xf32>
      %122 = arith.addf %117, %121 : vector<8x128xf32>
      %cst_59 = arith.constant 0.797884583 : f32
      %123 = vector.broadcast %cst_59 : f32 to vector<8x128xf32>
      %124 = arith.mulf %123, %122 : vector<8x128xf32>
      %125 = math.tanh %124 : vector<8x128xf32>
      %cst_60 = arith.constant 1.000000e+00 : f32
      %126 = vector.broadcast %cst_60 : f32 to vector<8x128xf32>
      %127 = arith.addf %126, %125 : vector<8x128xf32>
      %cst_61 = arith.constant 5.000000e-01 : f32
      %128 = vector.broadcast %cst_61 : f32 to vector<8x128xf32>
      %129 = arith.mulf %128, %127 : vector<8x128xf32>
      %130 = arith.mulf %117, %129 : vector<8x128xf32>
      %131 = arith.truncf %130 : vector<8x128xf32> to vector<8x128xbf16>
      %c0_62 = arith.constant 0 : index
      %c0_63 = arith.constant 0 : index
      %c0_64 = arith.constant 0 : index
      %132 = vector.load %arg18[%c0_62, %c0_63, %c0_64] : memref<1x128x64xbf16, #tpu.memory_space<vmem>>, vector<1x128x64xbf16>
      %133 = vector.shape_cast %132 : vector<1x128x64xbf16> to vector<128x64xbf16>
      %cst_65 = arith.constant dense<0.000000e+00> : vector<8x64xf32>
      %134 = tpu.matmul %131, %133, %cst_65 {dimension_numbers = #tpu.dot_dimension_numbers<[1], [0], [0], [1], [0, 0, 1, 1], [], []>} : vector<8x128xbf16>, vector<128x64xbf16>, vector<8x64xf32> -> vector<8x64xf32>
      %c0_66 = arith.constant 0 : index
      %c0_67 = arith.constant 0 : index
      %c0_68 = arith.constant 0 : index
      %135 = vector.load %arg19[%c0_66, %c0_67, %c0_68] : memref<1x1x64xf32, #tpu.memory_space<vmem>>, vector<1x1x64xf32>
      %136 = vector.shape_cast %135 : vector<1x1x64xf32> to vector<1x64xf32>
      %137 = vector.broadcast %136 : vector<1x64xf32> to vector<8x64xf32>
      %138 = arith.addf %134, %137 : vector<8x64xf32>
      %139 = arith.addf %109, %138 : vector<8x64xf32>
      %c0_69 = arith.constant 0 : index
      %c0_70 = arith.constant 0 : index
      %c0_71 = arith.constant 0 : index
      %140 = vector.load %arg20[%c0_69, %c0_70, %c0_71] : memref<1x1x64xf32, #tpu.memory_space<vmem>>, vector<1x1x64xf32>
      %141 = vector.shape_cast %140 : vector<1x1x64xf32> to vector<1x64xf32>
      %c0_72 = arith.constant 0 : index
      %c0_73 = arith.constant 0 : index
      %c0_74 = arith.constant 0 : index
      %142 = vector.load %arg21[%c0_72, %c0_73, %c0_74] : memref<1x1x64xf32, #tpu.memory_space<vmem>>, vector<1x1x64xf32>
      %143 = vector.shape_cast %142 : vector<1x1x64xf32> to vector<1x64xf32>
      %cst_75 = arith.constant dense<0.000000e+00> : vector<8xf32>
      %144 = vector.multi_reduction <add>, %139, %cst_75 [1] : vector<8x64xf32> to vector<8xf32>
      %145 = vector.shape_cast %144 : vector<8xf32> to vector<8x1xf32>
      %cst_76 = arith.constant 6.400000e+01 : f32
      %146 = vector.broadcast %cst_76 : f32 to vector<8x1xf32>
      %147 = arith.divf %145, %146 : vector<8x1xf32>
      %148 = vector.broadcast %147 : vector<8x1xf32> to vector<8x64xf32>
      %149 = arith.subf %139, %148 : vector<8x64xf32>
      %150 = arith.mulf %149, %149 : vector<8x64xf32>
      %cst_77 = arith.constant dense<0.000000e+00> : vector<8xf32>
      %151 = vector.multi_reduction <add>, %150, %cst_77 [1] : vector<8x64xf32> to vector<8xf32>
      %152 = vector.shape_cast %151 : vector<8xf32> to vector<8x1xf32>
      %cst_78 = arith.constant 6.400000e+01 : f32
      %153 = vector.broadcast %cst_78 : f32 to vector<8x1xf32>
      %154 = arith.divf %152, %153 : vector<8x1xf32>
      %155 = vector.broadcast %147 : vector<8x1xf32> to vector<8x64xf32>
      %156 = arith.subf %139, %155 : vector<8x64xf32>
      %cst_79 = arith.constant 9.99999996E-13 : f32
      %157 = vector.broadcast %cst_79 : f32 to vector<8x1xf32>
      %158 = arith.addf %154, %157 : vector<8x1xf32>
      %159 = math.rsqrt %158 : vector<8x1xf32>
      %160 = vector.broadcast %159 : vector<8x1xf32> to vector<8x64xf32>
      %161 = arith.mulf %156, %160 : vector<8x64xf32>
      %162 = vector.broadcast %141 : vector<1x64xf32> to vector<8x64xf32>
      %163 = arith.mulf %161, %162 : vector<8x64xf32>
      %164 = vector.broadcast %143 : vector<1x64xf32> to vector<8x64xf32>
      %165 = arith.addf %163, %164 : vector<8x64xf32>
      %c0_80 = arith.constant 0 : index
      %c0_81 = arith.constant 0 : index
      %166 = vector.load %arg23[%c0_80, %c0_81] : memref<8x64xf32, #tpu.memory_space<vmem>>, vector<8x64xf32>
      tpu.vector_store %arg23[%c0_80, %c0_81], %165 {strides = array<i32>} : memref<8x64xf32, #tpu.memory_space<vmem>>, vector<8x64xf32>,
    } else {
    }
    %c1_i32_6 = arith.constant 1 : i32
    %10 = arith.cmpi eq, %arg1, %c1_i32_6 : i32
    %11 = arith.extui %10 : i1 to i32
    %c0_i32_7 = arith.constant 0 : i32
    %12 = arith.cmpi ne, %11, %c0_i32_7 : i32
    scf.if %12 {
      %13 = vector.extract_strided_slice %4 {offsets = [0, 0], sizes = [1, 64], strides = [1, 1]} : vector<8x64xbf16> to vector<1x64xbf16>
      %c0_8 = arith.constant 0 : index
      %c0_9 = arith.constant 0 : index
      %c0_10 = arith.constant 0 : index
      %14 = vector.load %arg6[%c0_8, %c0_9, %c0_10] : memref<1x64x64xbf16, #tpu.memory_space<vmem>>, vector<1x64x64xbf16>
      %15 = vector.shape_cast %14 : vector<1x64x64xbf16> to vector<64x64xbf16>
      %cst = arith.constant dense<0.000000e+00> : vector<1x64xf32>
      %16 = tpu.matmul %13, %15, %cst {dimension_numbers = #tpu.dot_dimension_numbers<[1], [0], [0], [1], [0, 0, 1, 1], [], []>} : vector<1x64xbf16>, vector<64x64xbf16>, vector<1x64xf32> -> vector<1x64xf32>
      %c0_11 = arith.constant 0 : index
      %c0_12 = arith.constant 0 : index
      %c0_13 = arith.constant 0 : index
      %17 = vector.load %arg10[%c0_11, %c0_12, %c0_13] : memref<1x1x64xf32, #tpu.memory_space<vmem>>, vector<1x1x64xf32>
      %18 = vector.shape_cast %17 : vector<1x1x64xf32> to vector<1x64xf32>
      %19 = arith.addf %16, %18 : vector<1x64xf32>
      %cst_14 = arith.constant 0.176776692 : f32
      %20 = vector.broadcast %cst_14 : f32 to vector<1x64xf32>
      %21 = arith.mulf %19, %20 : vector<1x64xf32>
      %c0_15 = arith.constant 0 : index
      %c0_16 = arith.constant 0 : index
      %c0_17 = arith.constant 0 : index
      %22 = vector.load %arg7[%c0_15, %c0_16, %c0_17] : memref<1x64x64xbf16, #tpu.memory_space<vmem>>, vector<1x64x64xbf16>
      %23 = vector.shape_cast %22 : vector<1x64x64xbf16> to vector<64x64xbf16>
      %cst_18 = arith.constant dense<0.000000e+00> : vector<8x64xf32>
      %24 = tpu.matmul %4, %23, %cst_18 {dimension_numbers = #tpu.dot_dimension_numbers<[1], [0], [0], [1], [0, 0, 1, 1], [], []>} : vector<8x64xbf16>, vector<64x64xbf16>, vector<8x64xf32> -> vector<8x64xf32>
      %c0_19 = arith.constant 0 : index
      %c0_20 = arith.constant 0 : index
      %c0_21 = arith.constant 0 : index
      %25 = vector.load %arg11[%c0_19, %c0_20, %c0_21] : memref<1x1x64xf32, #tpu.memory_space<vmem>>, vector<1x1x64xf32>
      %26 = vector.shape_cast %25 : vector<1x1x64xf32> to vector<1x64xf32>
      %27 = vector.broadcast %26 : vector<1x64xf32> to vector<8x64xf32>
      %28 = arith.addf %24, %27 : vector<8x64xf32>
      %c0_22 = arith.constant 0 : index
      %c0_23 = arith.constant 0 : index
      %c0_24 = arith.constant 0 : index
      %29 = vector.load %arg8[%c0_22, %c0_23, %c0_24] : memref<1x64x64xbf16, #tpu.memory_space<vmem>>, vector<1x64x64xbf16>
      %30 = vector.shape_cast %29 : vector<1x64x64xbf16> to vector<64x64xbf16>
      %cst_25 = arith.constant dense<0.000000e+00> : vector<8x64xf32>
      %31 = tpu.matmul %4, %30, %cst_25 {dimension_numbers = #tpu.dot_dimension_numbers<[1], [0], [0], [1], [0, 0, 1, 1], [], []>} : vector<8x64xbf16>, vector<64x64xbf16>, vector<8x64xf32> -> vector<8x64xf32>
      %c0_26 = arith.constant 0 : index
      %c0_27 = arith.constant 0 : index
      %c0_28 = arith.constant 0 : index
      %32 = vector.load %arg12[%c0_26, %c0_27, %c0_28] : memref<1x1x64xf32, #tpu.memory_space<vmem>>, vector<1x1x64xf32>
      %33 = vector.shape_cast %32 : vector<1x1x64xf32> to vector<1x64xf32>
      %34 = vector.broadcast %33 : vector<1x64xf32> to vector<8x64xf32>
      %35 = arith.addf %31, %34 : vector<8x64xf32>
      %36 = vector.extract_strided_slice %21 {offsets = [0, 0], sizes = [1, 32], strides = [1, 1]} : vector<1x64xf32> to vector<1x32xf32>
      %37 = vector.extract_strided_slice %21 {offsets = [0, 32], sizes = [1, 32], strides = [1, 1]} : vector<1x64xf32> to vector<1x32xf32>
      %38 = vector.shape_cast %36 : vector<1x32xf32> to vector<1x1x32xf32>
      %39 = vector.shape_cast %37 : vector<1x32xf32> to vector<1x1x32xf32>
      %40 = tpu.concatenate %38, %39 in 0 : vector<1x1x32xf32>, vector<1x1x32xf32> -> vector<2x1x32xf32>
      %41 = arith.truncf %40 : vector<2x1x32xf32> to vector<2x1x32xbf16>
      %42 = vector.extract_strided_slice %28 {offsets = [0, 0], sizes = [8, 32], strides = [1, 1]} : vector<8x64xf32> to vector<8x32xf32>
      %43 = vector.extract_strided_slice %28 {offsets = [0, 32], sizes = [8, 32], strides = [1, 1]} : vector<8x64xf32> to vector<8x32xf32>
      %44 = vector.shape_cast %42 : vector<8x32xf32> to vector<1x8x32xf32>
      %45 = vector.shape_cast %43 : vector<8x32xf32> to vector<1x8x32xf32>
      %46 = tpu.concatenate %44, %45 in 0 : vector<1x8x32xf32>, vector<1x8x32xf32> -> vector<2x8x32xf32>
      %47 = arith.truncf %46 : vector<2x8x32xf32> to vector<2x8x32xbf16>
      %48 = vector.extract_strided_slice %35 {offsets = [0, 0], sizes = [8, 32], strides = [1, 1]} : vector<8x64xf32> to vector<8x32xf32>
      %49 = vector.extract_strided_slice %35 {offsets = [0, 32], sizes = [8, 32], strides = [1, 1]} : vector<8x64xf32> to vector<8x32xf32>
      %50 = vector.shape_cast %48 : vector<8x32xf32> to vector<1x8x32xf32>
      %51 = vector.shape_cast %49 : vector<8x32xf32> to vector<1x8x32xf32>
      %52 = tpu.concatenate %50, %51 in 0 : vector<1x8x32xf32>, vector<1x8x32xf32> -> vector<2x8x32xf32>
      %53 = arith.truncf %52 : vector<2x8x32xf32> to vector<2x8x32xbf16>
      "tpu.trace_start"() <{level = 10 : i32, message = "hqd,hkd->hqk"}> : () -> ()
      %cst_29 = arith.constant dense<0.000000e+00> : vector<2x1x8xf32>
      %54 = tpu.matmul %41, %47, %cst_29 {dimension_numbers = #tpu.dot_dimension_numbers<[2], [2], [1], [1], [0, 0, 0, 1, 1, 1], [0], [0]>} : vector<2x1x32xbf16>, vector<2x8x32xbf16>, vector<2x1x8xf32> -> vector<2x1x8xf32>
      "tpu.trace_stop"() : () -> ()
      %55 = vector.shape_cast %6 : vector<1x8xf32> to vector<1x1x8xf32>
      %56 = vector.broadcast %55 : vector<1x1x8xf32> to vector<2x1x8xf32>
      %57 = arith.addf %54, %56 : vector<2x1x8xf32>
      %cst_30 = arith.constant dense<0xFF800000> : vector<2x1xf32>
      %58 = vector.multi_reduction <maximumf>, %57, %cst_30 [2] : vector<2x1x8xf32> to vector<2x1xf32>
      %59 = vector.shape_cast %58 : vector<2x1xf32> to vector<2x1x1xf32>
      %60 = vector.broadcast %59 : vector<2x1x1xf32> to vector<2x1x8xf32>
      %61 = arith.subf %57, %60 : vector<2x1x8xf32>
      %62 = math.exp %61 : vector<2x1x8xf32>
      %cst_31 = arith.constant dense<0.000000e+00> : vector<2x1xf32>
      %63 = vector.multi_reduction <add>, %62, %cst_31 [2] : vector<2x1x8xf32> to vector<2x1xf32>
      %64 = vector.shape_cast %63 : vector<2x1xf32> to vector<2x1x1xf32>
      %65 = arith.truncf %62 : vector<2x1x8xf32> to vector<2x1x8xbf16>
      "tpu.trace_start"() <{level = 10 : i32, message = "hqk,hkd->hqd"}> : () -> ()
      %cst_32 = arith.constant dense<0.000000e+00> : vector<2x1x32xf32>
      %66 = tpu.matmul %65, %53, %cst_32 {dimension_numbers = #tpu.dot_dimension_numbers<[2], [1], [1], [2], [0, 0, 0, 1, 1, 2], [0], [0]>} : vector<2x1x8xbf16>, vector<2x8x32xbf16>, vector<2x1x32xf32> -> vector<2x1x32xf32>
      "tpu.trace_stop"() : () -> ()
      %67 = tpu.reciprocal %64 {approx = true} : vector<2x1x1xf32> -> vector<2x1x1xf32>
      %68 = vector.broadcast %67 : vector<2x1x1xf32> to vector<2x1x32xf32>
      %69 = arith.mulf %66, %68 : vector<2x1x32xf32>
      %70 = vector.extract_strided_slice %69 {offsets = [0, 0, 0], sizes = [1, 1, 32], strides = [1, 1, 1]} : vector<2x1x32xf32> to vector<1x1x32xf32>
      %71 = vector.shape_cast %70 : vector<1x1x32xf32> to vector<1x32xf32>
      %72 = vector.extract_strided_slice %69 {offsets = [1, 0, 0], sizes = [1, 1, 32], strides = [1, 1, 1]} : vector<2x1x32xf32> to vector<1x1x32xf32>
      %73 = vector.shape_cast %72 : vector<1x1x32xf32> to vector<1x32xf32>
      %74 = tpu.concatenate %71, %73 in 1 : vector<1x32xf32>, vector<1x32xf32> -> vector<1x64xf32>
      %75 = arith.truncf %74 : vector<1x64xf32> to vector<1x64xbf16>
      %c0_33 = arith.constant 0 : index
      %c0_34 = arith.constant 0 : index
      %c0_35 = arith.constant 0 : index
      %76 = vector.load %arg9[%c0_33, %c0_34, %c0_35] : memref<1x64x64xbf16, #tpu.memory_space<vmem>>, vector<1x64x64xbf16>
      %77 = vector.shape_cast %76 : vector<1x64x64xbf16> to vector<64x64xbf16>
      %cst_36 = arith.constant dense<0.000000e+00> : vector<1x64xf32>
      %78 = tpu.matmul %75, %77, %cst_36 {dimension_numbers = #tpu.dot_dimension_numbers<[1], [0], [0], [1], [0, 0, 1, 1], [], []>} : vector<1x64xbf16>, vector<64x64xbf16>, vector<1x64xf32> -> vector<1x64xf32>
      %c0_37 = arith.constant 0 : index
      %c0_38 = arith.constant 0 : index
      %c0_39 = arith.constant 0 : index
      %79 = vector.load %arg13[%c0_37, %c0_38, %c0_39] : memref<1x1x64xf32, #tpu.memory_space<vmem>>, vector<1x1x64xf32>
      %80 = vector.shape_cast %79 : vector<1x1x64xf32> to vector<1x64xf32>
      %81 = arith.addf %78, %80 : vector<1x64xf32>
      %82 = vector.extract_strided_slice %3 {offsets = [0, 0], sizes = [1, 64], strides = [1, 1]} : vector<8x64xf32> to vector<1x64xf32>
      %83 = arith.addf %82, %81 : vector<1x64xf32>
      %c0_40 = arith.constant 0 : index
      %c0_41 = arith.constant 0 : index
      %c0_42 = arith.constant 0 : index
      %84 = vector.load %arg14[%c0_40, %c0_41, %c0_42] : memref<1x1x64xf32, #tpu.memory_space<vmem>>, vector<1x1x64xf32>
      %85 = vector.shape_cast %84 : vector<1x1x64xf32> to vector<1x64xf32>
      %c0_43 = arith.constant 0 : index
      %c0_44 = arith.constant 0 : index
      %c0_45 = arith.constant 0 : index
      %86 = vector.load %arg15[%c0_43, %c0_44, %c0_45] : memref<1x1x64xf32, #tpu.memory_space<vmem>>, vector<1x1x64xf32>
      %87 = vector.shape_cast %86 : vector<1x1x64xf32> to vector<1x64xf32>
      %cst_46 = arith.constant dense<0.000000e+00> : vector<1xf32>
      %88 = vector.multi_reduction <add>, %83, %cst_46 [1] : vector<1x64xf32> to vector<1xf32>
      %89 = vector.shape_cast %88 : vector<1xf32> to vector<1x1xf32>
      %cst_47 = arith.constant 6.400000e+01 : f32
      %90 = vector.broadcast %cst_47 : f32 to vector<1x1xf32>
      %91 = arith.divf %89, %90 : vector<1x1xf32>
      %92 = vector.broadcast %91 : vector<1x1xf32> to vector<1x64xf32>
      %93 = arith.subf %83, %92 : vector<1x64xf32>
      %94 = arith.mulf %93, %93 : vector<1x64xf32>
      %cst_48 = arith.constant dense<0.000000e+00> : vector<1xf32>
      %95 = vector.multi_reduction <add>, %94, %cst_48 [1] : vector<1x64xf32> to vector<1xf32>
      %96 = vector.shape_cast %95 : vector<1xf32> to vector<1x1xf32>
      %cst_49 = arith.constant 6.400000e+01 : f32
      %97 = vector.broadcast %cst_49 : f32 to vector<1x1xf32>
      %98 = arith.divf %96, %97 : vector<1x1xf32>
      %99 = vector.broadcast %91 : vector<1x1xf32> to vector<1x64xf32>
      %100 = arith.subf %83, %99 : vector<1x64xf32>
      %cst_50 = arith.constant 9.99999996E-13 : f32
      %101 = vector.broadcast %cst_50 : f32 to vector<1x1xf32>
      %102 = arith.addf %98, %101 : vector<1x1xf32>
      %103 = math.rsqrt %102 : vector<1x1xf32>
      %104 = vector.broadcast %103 : vector<1x1xf32> to vector<1x64xf32>
      %105 = arith.mulf %100, %104 : vector<1x64xf32>
      %106 = arith.mulf %105, %85 : vector<1x64xf32>
      %107 = arith.addf %106, %87 : vector<1x64xf32>
      %108 = arith.truncf %107 : vector<1x64xf32> to vector<1x64xbf16>
      %c0_51 = arith.constant 0 : index
      %c0_52 = arith.constant 0 : index
      %c0_53 = arith.constant 0 : index
      %109 = vector.load %arg16[%c0_51, %c0_52, %c0_53] : memref<1x64x128xbf16, #tpu.memory_space<vmem>>, vector<1x64x128xbf16>
      %110 = vector.shape_cast %109 : vector<1x64x128xbf16> to vector<64x128xbf16>
      %cst_54 = arith.constant dense<0.000000e+00> : vector<1x128xf32>
      %111 = tpu.matmul %108, %110, %cst_54 {dimension_numbers = #tpu.dot_dimension_numbers<[1], [0], [0], [1], [0, 0, 1, 1], [], []>} : vector<1x64xbf16>, vector<64x128xbf16>, vector<1x128xf32> -> vector<1x128xf32>
      %c0_55 = arith.constant 0 : index
      %c0_56 = arith.constant 0 : index
      %c0_57 = arith.constant 0 : index
      %112 = vector.load %arg17[%c0_55, %c0_56, %c0_57] : memref<1x1x128xf32, #tpu.memory_space<vmem>>, vector<1x1x128xf32>
      %113 = vector.shape_cast %112 : vector<1x1x128xf32> to vector<1x128xf32>
      %114 = arith.addf %111, %113 : vector<1x128xf32>
      %115 = arith.mulf %114, %114 : vector<1x128xf32>
      %116 = arith.mulf %114, %115 : vector<1x128xf32>
      %cst_58 = arith.constant 4.471500e-02 : f32
      %117 = vector.broadcast %cst_58 : f32 to vector<1x128xf32>
      %118 = arith.mulf %117, %116 : vector<1x128xf32>
      %119 = arith.addf %114, %118 : vector<1x128xf32>
      %cst_59 = arith.constant 0.797884583 : f32
      %120 = vector.broadcast %cst_59 : f32 to vector<1x128xf32>
      %121 = arith.mulf %120, %119 : vector<1x128xf32>
      %122 = math.tanh %121 : vector<1x128xf32>
      %cst_60 = arith.constant 1.000000e+00 : f32
      %123 = vector.broadcast %cst_60 : f32 to vector<1x128xf32>
      %124 = arith.addf %123, %122 : vector<1x128xf32>
      %cst_61 = arith.constant 5.000000e-01 : f32
      %125 = vector.broadcast %cst_61 : f32 to vector<1x128xf32>
      %126 = arith.mulf %125, %124 : vector<1x128xf32>
      %127 = arith.mulf %114, %126 : vector<1x128xf32>
      %128 = arith.truncf %127 : vector<1x128xf32> to vector<1x128xbf16>
      %c0_62 = arith.constant 0 : index
      %c0_63 = arith.constant 0 : index
      %c0_64 = arith.constant 0 : index
      %129 = vector.load %arg18[%c0_62, %c0_63, %c0_64] : memref<1x128x64xbf16, #tpu.memory_space<vmem>>, vector<1x128x64xbf16>
      %130 = vector.shape_cast %129 : vector<1x128x64xbf16> to vector<128x64xbf16>
      %cst_65 = arith.constant dense<0.000000e+00> : vector<1x64xf32>
      %131 = tpu.matmul %128, %130, %cst_65 {dimension_numbers = #tpu.dot_dimension_numbers<[1], [0], [0], [1], [0, 0, 1, 1], [], []>} : vector<1x128xbf16>, vector<128x64xbf16>, vector<1x64xf32> -> vector<1x64xf32>
      %c0_66 = arith.constant 0 : index
      %c0_67 = arith.constant 0 : index
      %c0_68 = arith.constant 0 : index
      %132 = vector.load %arg19[%c0_66, %c0_67, %c0_68] : memref<1x1x64xf32, #tpu.memory_space<vmem>>, vector<1x1x64xf32>
      %133 = vector.shape_cast %132 : vector<1x1x64xf32> to vector<1x64xf32>
      %134 = arith.addf %131, %133 : vector<1x64xf32>
      %135 = arith.addf %107, %134 : vector<1x64xf32>
      %c0_69 = arith.constant 0 : index
      %c0_70 = arith.constant 0 : index
      %c0_71 = arith.constant 0 : index
      %136 = vector.load %arg20[%c0_69, %c0_70, %c0_71] : memref<1x1x64xf32, #tpu.memory_space<vmem>>, vector<1x1x64xf32>
      %137 = vector.shape_cast %136 : vector<1x1x64xf32> to vector<1x64xf32>
      %c0_72 = arith.constant 0 : index
      %c0_73 = arith.constant 0 : index
      %c0_74 = arith.constant 0 : index
      %138 = vector.load %arg21[%c0_72, %c0_73, %c0_74] : memref<1x1x64xf32, #tpu.memory_space<vmem>>, vector<1x1x64xf32>
      %139 = vector.shape_cast %138 : vector<1x1x64xf32> to vector<1x64xf32>
      %cst_75 = arith.constant dense<0.000000e+00> : vector<1xf32>
      %140 = vector.multi_reduction <add>, %135, %cst_75 [1] : vector<1x64xf32> to vector<1xf32>
      %141 = vector.shape_cast %140 : vector<1xf32> to vector<1x1xf32>
      %cst_76 = arith.constant 6.400000e+01 : f32
      %142 = vector.broadcast %cst_76 : f32 to vector<1x1xf32>
      %143 = arith.divf %141, %142 : vector<1x1xf32>
      %144 = vector.broadcast %143 : vector<1x1xf32> to vector<1x64xf32>
      %145 = arith.subf %135, %144 : vector<1x64xf32>
      %146 = arith.mulf %145, %145 : vector<1x64xf32>
      %cst_77 = arith.constant dense<0.000000e+00> : vector<1xf32>
      %147 = vector.multi_reduction <add>, %146, %cst_77 [1] : vector<1x64xf32> to vector<1xf32>
      %148 = vector.shape_cast %147 : vector<1xf32> to vector<1x1xf32>
      %cst_78 = arith.constant 6.400000e+01 : f32
      %149 = vector.broadcast %cst_78 : f32 to vector<1x1xf32>
      %150 = arith.divf %148, %149 : vector<1x1xf32>
      %151 = vector.broadcast %143 : vector<1x1xf32> to vector<1x64xf32>
      %152 = arith.subf %135, %151 : vector<1x64xf32>
      %cst_79 = arith.constant 9.99999996E-13 : f32
      %153 = vector.broadcast %cst_79 : f32 to vector<1x1xf32>
      %154 = arith.addf %150, %153 : vector<1x1xf32>
      %155 = math.rsqrt %154 : vector<1x1xf32>
      %156 = vector.broadcast %155 : vector<1x1xf32> to vector<1x64xf32>
      %157 = arith.mulf %152, %156 : vector<1x64xf32>
      %158 = arith.mulf %157, %137 : vector<1x64xf32>
      %159 = arith.addf %158, %139 : vector<1x64xf32>
      %160 = arith.truncf %159 : vector<1x64xf32> to vector<1x64xbf16>
      %c0_80 = arith.constant 0 : index
      %c0_81 = arith.constant 0 : index
      %c0_82 = arith.constant 0 : index
      %161 = vector.load %arg22[%c0_80, %c0_81, %c0_82] : memref<1x1x64xbf16, #tpu.memory_space<vmem>>, vector<1x1x64xbf16>
      %162 = vector.shape_cast %161 : vector<1x1x64xbf16> to vector<1x64xbf16>
      %163 = vector.shape_cast %160 : vector<1x64xbf16> to vector<1x1x64xbf16>
      tpu.vector_store %arg22[%c0_80, %c0_81, %c0_82], %163 {strides = array<i32>} : memref<1x1x64xbf16, #tpu.memory_space<vmem>>, vector<1x1x64xbf16>,
    } else {
    }
    return
  }
  func.func @transform_0(%arg0: i32, %arg1: i32) -> (i32, i32, i32) {
    %c0_i32 = arith.constant 0 : i32
    %c0_i32_0 = arith.constant 0 : i32
    %c0_i32_1 = arith.constant 0 : i32
    return %arg0, %c0_i32, %c0_i32_0 : i32, i32, i32
  }
  func.func @transform_1(%arg0: i32, %arg1: i32) -> (i32, i32, i32) {
    %c0_i32 = arith.constant 0 : i32
    %c0_i32_0 = arith.constant 0 : i32
    %c0_i32_1 = arith.constant 0 : i32
    return %arg0, %c0_i32, %c0_i32_0 : i32, i32, i32
  }
  func.func @transform_2(%arg0: i32, %arg1: i32) -> (i32, i32) {
    %c0_i32 = arith.constant 0 : i32
    %c0_i32_0 = arith.constant 0 : i32
    %c0_i32_1 = arith.constant 0 : i32
    return %c0_i32, %c0_i32_0 : i32, i32
  }
  func.func @transform_3(%arg0: i32, %arg1: i32) -> (i32, i32) {
    %c0_i32 = arith.constant 0 : i32
    %c0_i32_0 = arith.constant 0 : i32
    %c0_i32_1 = arith.constant 0 : i32
    return %c0_i32, %c0_i32_0 : i32, i32
  }
  func.func @transform_4(%arg0: i32, %arg1: i32) -> (i32, i32, i32) {
    %c0_i32 = arith.constant 0 : i32
    %c0_i32_0 = arith.constant 0 : i32
    %c0_i32_1 = arith.constant 0 : i32
    return %arg1, %c0_i32, %c0_i32_0 : i32, i32, i32
  }
  func.func @transform_5(%arg0: i32, %arg1: i32) -> (i32, i32, i32) {
    %c0_i32 = arith.constant 0 : i32
    %c0_i32_0 = arith.constant 0 : i32
    %c0_i32_1 = arith.constant 0 : i32
    return %arg1, %c0_i32, %c0_i32_0 : i32, i32, i32
  }
  func.func @transform_6(%arg0: i32, %arg1: i32) -> (i32, i32, i32) {
    %c0_i32 = arith.constant 0 : i32
    %c0_i32_0 = arith.constant 0 : i32
    %c0_i32_1 = arith.constant 0 : i32
    return %arg1, %c0_i32, %c0_i32_0 : i32, i32, i32
  }
  func.func @transform_7(%arg0: i32, %arg1: i32) -> (i32, i32, i32) {
    %c0_i32 = arith.constant 0 : i32
    %c0_i32_0 = arith.constant 0 : i32
    %c0_i32_1 = arith.constant 0 : i32
    return %arg1, %c0_i32, %c0_i32_0 : i32, i32, i32
  }
  func.func @transform_8(%arg0: i32, %arg1: i32) -> (i32, i32, i32) {
    %c0_i32 = arith.constant 0 : i32
    %c0_i32_0 = arith.constant 0 : i32
    %c0_i32_1 = arith.constant 0 : i32
    return %arg1, %c0_i32, %c0_i32_0 : i32, i32, i32
  }
  func.func @transform_9(%arg0: i32, %arg1: i32) -> (i32, i32, i32) {
    %c0_i32 = arith.constant 0 : i32
    %c0_i32_0 = arith.constant 0 : i32
    %c0_i32_1 = arith.constant 0 : i32
    return %arg1, %c0_i32, %c0_i32_0 : i32, i32, i32
  }
  func.func @transform_10(%arg0: i32, %arg1: i32) -> (i32, i32, i32) {
    %c0_i32 = arith.constant 0 : i32
    %c0_i32_0 = arith.constant 0 : i32
    %c0_i32_1 = arith.constant 0 : i32
    return %arg1, %c0_i32, %c0_i32_0 : i32, i32, i32
  }
  func.func @transform_11(%arg0: i32, %arg1: i32) -> (i32, i32, i32) {
    %c0_i32 = arith.constant 0 : i32
    %c0_i32_0 = arith.constant 0 : i32
    %c0_i32_1 = arith.constant 0 : i32
    return %arg1, %c0_i32, %c0_i32_0 : i32, i32, i32
  }
  func.func @transform_12(%arg0: i32, %arg1: i32) -> (i32, i32, i32) {
    %c0_i32 = arith.constant 0 : i32
    %c0_i32_0 = arith.constant 0 : i32
    %c0_i32_1 = arith.constant 0 : i32
    return %arg1, %c0_i32, %c0_i32_0 : i32, i32, i32
  }
  func.func @transform_13(%arg0: i32, %arg1: i32) -> (i32, i32, i32) {
    %c0_i32 = arith.constant 0 : i32
    %c0_i32_0 = arith.constant 0 : i32
    %c0_i32_1 = arith.constant 0 : i32
    return %arg1, %c0_i32, %c0_i32_0 : i32, i32, i32
  }
  func.func @transform_14(%arg0: i32, %arg1: i32) -> (i32, i32, i32) {
    %c0_i32 = arith.constant 0 : i32
    %c0_i32_0 = arith.constant 0 : i32
    %c0_i32_1 = arith.constant 0 : i32
    return %arg1, %c0_i32, %c0_i32_0 : i32, i32, i32
  }
  func.func @transform_15(%arg0: i32, %arg1: i32) -> (i32, i32, i32) {
    %c0_i32 = arith.constant 0 : i32
    %c0_i32_0 = arith.constant 0 : i32
    %c0_i32_1 = arith.constant 0 : i32
    return %arg1, %c0_i32, %c0_i32_0 : i32, i32, i32
  }
  func.func @transform_16(%arg0: i32, %arg1: i32) -> (i32, i32, i32) {
    %c0_i32 = arith.constant 0 : i32
    %c0_i32_0 = arith.constant 0 : i32
    %c0_i32_1 = arith.constant 0 : i32
    return %arg1, %c0_i32, %c0_i32_0 : i32, i32, i32
  }
  func.func @transform_17(%arg0: i32, %arg1: i32) -> (i32, i32, i32) {
    %c0_i32 = arith.constant 0 : i32
    %c0_i32_0 = arith.constant 0 : i32
    %c0_i32_1 = arith.constant 0 : i32
    return %arg1, %c0_i32, %c0_i32_0 : i32, i32, i32
  }
  func.func @transform_18(%arg0: i32, %arg1: i32) -> (i32, i32, i32) {
    %c0_i32 = arith.constant 0 : i32
    %c0_i32_0 = arith.constant 0 : i32
    %c0_i32_1 = arith.constant 0 : i32
    return %arg1, %c0_i32, %c0_i32_0 : i32, i32, i32
  }
  func.func @transform_19(%arg0: i32, %arg1: i32) -> (i32, i32, i32) {
    %c0_i32 = arith.constant 0 : i32
    %c0_i32_0 = arith.constant 0 : i32
    %c0_i32_1 = arith.constant 0 : i32
    return %arg1, %c0_i32, %c0_i32_0 : i32, i32, i32
  }
  func.func @transform_20(%arg0: i32, %arg1: i32) -> (i32, i32, i32) {
    %c0_i32 = arith.constant 0 : i32
    %c0_i32_0 = arith.constant 0 : i32
    %c0_i32_1 = arith.constant 0 : i32
    return %arg0, %c0_i32, %c0_i32_0 : i32, i32, i32
  }
}

</mosaic_0001>

<bundles_post_ra>
// kernel: tpu_custom_call.1
= control target key start
LH: loop header
LB: loop body
LE: loop exit
PB: predicated region body
PF: predicated region fallthrough
CT: control target
= control target key end

     0   :  { %s4654_s0 = inlined_call_operand.hbm [shape: bf16[2,8,64], index: 0, kind: input, shape index: {}]   ;;  %s4655_s1 = inlined_call_operand.vmem [shape: f32[2,1,8], index: 1, kind: input, shape index: {}]   ;;  %s4656_s2 = inlined_call_operand.hbm [shape: f32[1,64], index: 2, kind: input, shape index: {}]   ;;  %s4657_s3 = inlined_call_operand.hbm [shape: f32[1,64], index: 3, kind: input, shape index: {}]   ;;  %s4658_s4 = inlined_call_operand.vmem [shape: bf16[2,64,64], index: 4, kind: input, shape index: {}]   ;;  %s4659_s5 = inlined_call_operand.vmem [shape: bf16[2,64,64], index: 5, kind: input, shape index: {}]   ;;  %s4660_s6 = inlined_call_operand.vmem [shape: bf16[2,64,64], index: 6, kind: input, shape index: {}]   ;;  %s4661_s7 = inlined_call_operand.hbm [shape: bf16[2,64,64], index: 7, kind: input, shape index: {}]   ;;  %s4662_s8 = inlined_call_operand.vmem [shape: f32[2,1,64], index: 8, kind: input, shape index: {}]   ;;  %s4663_s9 = inlined_call_operand.vmem [shape: f32[2,1,64], index: 9, kind: input, shape index: {}]   ;;  %s4664_s10 = inlined_call_operand.vmem [shape: f32[2,1,64], index: 10, kind: input, shape index: {}]   ;;  %s4665_s11 = inlined_call_operand.vmem [shape: f32[2,1,64], index: 11, kind: input, shape index: {}]   ;;  %s4666_s12 = inlined_call_operand.vmem [shape: f32[2,1,64], index: 12, kind: input, shape index: {}]   ;;  %s4667_s13 = inlined_call_operand.vmem [shape: f32[2,1,64], index: 13, kind: input, shape index: {}]   ;;  %s4668_s14 = inlined_call_operand.hbm [shape: bf16[2,64,128], index: 14, kind: input, shape index: {}]   ;;  %s4669_s15 = inlined_call_operand.vmem [shape: f32[2,1,128], index: 15, kind: input, shape index: {}]   ;;  %s4670_s16 = inlined_call_operand.vmem [shape: bf16[2,128,64], index: 16, kind: input, shape index: {}]   ;;  %s4671_s17 = inlined_call_operand.vmem [shape: f32[2,1,64], index: 17, kind: input, shape index: {}]   ;;  %s4672_s18 = inlined_call_operand.vmem [shape: f32[2,1,64], index: 18, kind: input, shape index: {}]   ;;  %s4673_s19 = inlined_call_operand.vmem [shape: f32[2,1,64], index: 19, kind: input, shape index: {}]   ;;  %s4674_s20 = inlined_call_operand.vmem [shape: bf16[2,1,64], index: 20, kind: output, shape index: {}]  }
   0x1   :  { %4711 = sst [smem:[#allocation34_spill]] %s4654_s0 }
   0x2   :  { %4712 = sst [smem:[#allocation35_spill]] %s4655_s1 }
   0x3   :  { %4713 = sst [smem:[#allocation36_spill]] %s4656_s2 }
   0x4   :  { %4714 = sst [smem:[#allocation37_spill]] %s4657_s3 }
   0x5   :  { %4715 = sst [smem:[#allocation38_spill]] %s4658_s4 }
   0x6   :  { %4716 = sst [smem:[#allocation39_spill]] %s4659_s5 }
   0x7   :  { %4717 = sst [smem:[#allocation40_spill]] %s4660_s6 }
   0x8   :  { %4718 = sst [smem:[#allocation41_spill]] %s4661_s7 }
   0x9   :  { %4719 = sst [smem:[#allocation42_spill]] %s4662_s8 }
   0xa   :  { %4720 = sst [smem:[#allocation43_spill]] %s4663_s9 }
   0xb   :  { %4721 = sst [smem:[#allocation44_spill]] %s4664_s10 }
   0xc   :  { %4722 = sst [smem:[#allocation45_spill]] %s4665_s11 }
   0xd   :  { %4723 = sst [smem:[#allocation46_spill]] %s4666_s12 }
   0xe   :  { %4724 = sst [smem:[#allocation47_spill]] %s4667_s13 }
   0xf   :  { %4725 = sst [smem:[#allocation48_spill]] %s4668_s14 }
  0x10   :  { %4726 = sst [smem:[#allocation49_spill]] %s4669_s15 }
  0x11   :  { %4727 = sst [smem:[#allocation50_spill]] %s4670_s16 }
  0x12   :  { %4728 = sst [smem:[#allocation51_spill]] %s4671_s17 }
  0x13   :  { %4729 = sst [smem:[#allocation52_spill]] %s4672_s18 }
  0x14   :  { %4730 = sst [smem:[#allocation53_spill]] %s4673_s19 }
  0x15   :  { %4731 = sst [smem:[#allocation54_spill]] %s4674_s20 }
  0x16   :  { %25 = vsyncpa [#allocation4], 0 }
  0x17   :  { %27 = vsyncpa [#allocation4 + $0x1], 0 }
  0x18   :  { %28 = vsyncpa [#allocation6], 0 }
  0x19   :  { %29 = vsyncpa [#allocation9], 0 }
  0x1a   :  { %31 = vsyncpa [#allocation9 + $0x1], 0  ;;  %s3943_s1 = smov 0   ;;  %s3945_s22 = smov 0  }
  0x1b   :  { %s3947_s23 = smov 0   ;;  %s3949_s24 = smov 0  }
  0x1c   :  { %s3951_s2 = smov 0   ;;  %s3953_s25 = smov 0  }
  0x1d   :  { %s3955_s3 = smov 0   ;;  %s3957_s26 = smov 0  }
  0x1e   :  { %s3959_s27 = smov 0   ;;  %s3961_s28 = smov 0  }
  0x1f   :  { %s3963_s4 = smov 0  }
  0x20 LB: > { %4732 = sst [smem:[#allocation14_spill]] %s3785_s22  ;;  %s4678_s29 = sadd.s32 4294967295, %s3821_s4   ;;  %s3821_s4 = sphi %s3963_s4, %s37_s4   ;;  %s3817_s28 = sphi %s3961_s28, %s4827_s28   ;;  %s3813_s27 = sphi %s3959_s27, %s4826_s27   ;;  %s3809_s26 = sphi %s3957_s26, %s4825_s26   ;;  %s3805_s3 = sphi %s3955_s3, %s4824_s3   ;;  %s3801_s25 = sphi %s3953_s25, %s4823_s25   ;;  %s3797_s2 = sphi %s3951_s2, %s4822_s2   ;;  %s3793_s24 = sphi %s3949_s24, %s4821_s24   ;;  %s3789_s23 = sphi %s3947_s23, %s4820_s23   ;;  %s3785_s22 = sphi %s3945_s22, %s4819_s22   ;;  %s3781_s1 = sphi %s3943_s1, %s4818_s1  }
  0x21   : > { %4733 = sst [smem:[#allocation15_spill]] %s3789_s23  ;;  %p241_p0 = scmp.ne.s32.totalorder %s3785_s22, %s3781_s1 }
  0x22   : > { %4734 = sst [smem:[#allocation16_spill]] %s3797_s2  ;;  %p4000_p1 = scmp.eq.s32.totalorder %s4678_s29, 0 }
  0x23   : > { %4735 = sst [smem:[#allocation17_spill]] %s3801_s25  ;;  %p2938_p2 = scmp.ge.s32.totalorder %s3821_s4, 1 }
  0x24   : > { %4736 = sst [smem:[#allocation18_spill]] %s3805_s3  ;;  %p590_p3 = scmp.lt.s32.totalorder %s3821_s4, 5 }
  0x25   : > { %4737 = sst [smem:[#allocation19_spill]] %s3809_s26  ;;  %p4008_p4 = por %p241_p0, %p4000_p1 }
  0x26   : > { %4738 = sst [smem:[#allocation20_spill]] %s3813_s27  ;;  %p4012_p5 = pnand %p2938_p2, %p590_p3 }
  0x27   : > { %4739 = sst [smem:[#allocation21_spill]] %s3817_s28  ;;  %s3823_s1 = smov [#allocation5]  }
  0x28   : > { %4740 = sst [smem:[#allocation22_spill]] %s3821_s4  ;;  %s603_s19 = sshll.u32 %s3823_s1, 4  ;;  %s604_s19 = int_to_ptr.vmem [resolvable:$true] %s603_s19 }
  0x29   : > { %s4741_s30 = scalar_select %p4000_p1, 1, 0 }
  0x2a   : > { %s4742_s0 = scalar_select %p4008_p4, 1, 0 }
  0x2b   : > { %s4744_s21 = scalar_select %p4012_p5, 1, 0 }
  0x2c   : > { %4743 = sst [smem:[#allocation23_spill]] %s4742_s0  ;;  %p3369_p6 = pneg %p4012_p5 }
  0x2d   : > { %4745 = sst [smem:[#allocation24_spill]] %s4744_s21  ;;  %s46_s18 = sadd.s32 1, %s3813_s27 }
  0x2e   : > { %p4020_p7 = pnand %p3369_p6, %p4000_p1  ;;  %p4026_p9 = scmp.ge.s32.totalorder %s46_s18, 2 }
  0x2f   : > { %s4748_s13 = sld [smem:[#allocation36_spill]] }
  0x30   : > { %s4747_s17 = scalar_select %p4026_p9, 1, 0 }
  0x31   : > { %p4689_p11 = pneg %p4020_p7 }
  0x35   : > { %s3577_s1 = scalar_lea.hbm %s4748_s13, 16 }
  0x36   : > { %p3578_p10 = scmp.ne.s32.totalorder %s4748_s13, %s3577_s1  ;;  %p3584_p0 = scmp.lt.u32.totalorder %s3577_s1, %s4748_s13 }
  0x38   : > { %p3580_p12 = pnand %p4689_p11, %p3578_p10 }
  0x3a   : > { %p3581_p13 = pneg %p3580_p12 }
  0x3c   : > { %p3586_p2 = pnand %p3584_p0, %p3581_p13 }
  0x3e   : > { %3589 = shalt.err (!%p3586_p2)
}
  0x3f   : > { %s3590_s6 = scalar_lea.vmem %s604_s19, 16  ;;  %s3597_s11 = scalar_lea.vmem %s604_s19, 32 }
  0x40   : > { %p3591_p3 = scmp.ne.s32.totalorder %s604_s19, %s3590_s6  ;;  %p3598_p4 = scmp.lt.s32.totalorder %s604_s19, %s604_s19 }
  0x41   : > { %p3599_p5 = scmp.lt.s32.totalorder %s3597_s11, %s3590_s6 }
  0x42   : > { %p3593_p6 = pnand %p3591_p3, %p4689_p11 }
  0x43   : > { %p3600_p1 = por %p3599_p5, %p3598_p4 }
  0x44   : > { %p3594_p8 = pneg %p3593_p6 }
  0x46   : > { %p3601_p9 = pnand %p3600_p1, %p3594_p8 }
  0x48   : > { %3604 = shalt.err (!%p3601_p9)
}
  0x49   : > { %3372 = dma.hbm_to_vmem [thread:$0]  (!%p4020_p7), %s4748_s13, 16, %s604_s19, [#allocation6]  }
  0x4a   : > { %p4749_p1 = scmp.ne.s32.totalorder %s4747_s17, 0  ;;  %s228_s6 = sadd.s32 1, %s3789_s23 }
  0x4b   : > { %p235_p4 = scmp.ne.s32.totalorder %s3789_s23, %s3785_s22  ;;  %p4688_p5 = scmp.lt.s32.totalorder %s3821_s4, 4 }
  0x4c   : > { %s4829_s18 = smov (%p4749_p1, %s46_s18), 0  ;;  %p4751_p9 = scmp.eq.s32.totalorder %s3821_s4, 0 }
  0x4d   : > { %4750 = sst [smem:[#allocation25_spill]] %s4829_s18  ;;  %s225_s10 = ssub.s32 %s3813_s27, %s4829_s18 }
  0x4e   : > { %p226_p8 = scmp.eq.s32.totalorder %s225_s10, 0  ;;  %p237_p10 = por %p235_p4, %p4751_p9 }
  0x4f   : > { %s673_s15 = sand.u32 1, %s3821_s4   ;;  %s675_s16 = sand.u32 1, %s3789_s23  }
  0x50   : > { %s4067_s1 = scalar_select %p226_p8, %s3789_s23, %s228_s6  }
  0x51   : > { %s4069_s11 = sshll.u32 %s675_s16, 5  ;;  %s4686_s19 = sshll.u32 %s3813_s27, 9 }
  0x52   : > { %4752 = sst [smem:[#allocation26_spill]] %s4067_s1  ;;  %s4753_s7 = sld [smem:[#allocation41_spill]] }
  0x53   : > { %s677_s10 = scalar_lea.vmem [#allocation8], %s4069_s11  ;;  %p4084_p12 = pnand %p4688_p5, %p237_p10 }
  0x54   : > { %s684_s18 = sshll.u32 %s677_s10, 4  ;;  %s4088_s16 = scalar_lea.sflag [#allocation9], %s673_s15  ;;  %s4080_s18 = int_to_ptr.vmem [resolvable:$true] %s684_s18 }
  0x55   : > { %s4754_s6 = scalar_select %p4084_p12, 1, 0 }
  0x56   : > { %p4698_p0 = pneg %p4084_p12 }
  0x57   : > { %4755 = sst [smem:[#allocation27_spill]] %s4754_s6 }
  0x58   : > { %s4077_s13 = scalar_lea.hbm %s4753_s7, %s4686_s19  ;;  %s3610_s19 = scalar_lea.hbm %s4753_s7, 1024 }
  0x59   : > { %s3605_s12 = scalar_lea.hbm %s4077_s13, 512  ;;  %p3611_p6 = scmp.lt.u32.totalorder %s4077_s13, %s4753_s7 }
  0x5a   : > { %p3606_p13 = scmp.ne.s32.totalorder %s4077_s13, %s3605_s12  ;;  %p3612_p4 = scmp.lt.u32.totalorder %s3610_s19, %s3605_s12 }
  0x5b   : > { %p3614_p9 = scmp.lt.u32.totalorder %s3605_s12, %s4077_s13 }
  0x5c   : > { %p3608_p2 = pnand %p4698_p0, %p3606_p13  ;;  %p3613_p8 = por %p3612_p4, %p3611_p6 }
  0x5e   : > { %p3609_p3 = pneg %p3608_p2  ;;  %p3615_p10 = por %p3614_p9, %p3613_p8 }
  0x60   : > { %p3616_p5 = pnand %p3615_p10, %p3609_p3 }
  0x62   : > { %3619 = shalt.err (!%p3616_p5)
}
  0x63   : > { %s3620_s15 = scalar_lea.vmem %s4080_s18, 512  ;;  %s3824_s9 = smov [#allocation8]  }
  0x64   : > { %p3621_p13 = scmp.ne.s32.totalorder %s4080_s18, %s3620_s15  ;;  %s3625_s10 = sshll.u32 %s3824_s9, 4  ;;  %s3626_s10 = int_to_ptr.vmem [resolvable:$false] %s3625_s10 }
  0x65   : > { %s3627_s23 = scalar_lea.vmem %s3626_s10, 1024  ;;  %p3628_p1 = scmp.lt.s32.totalorder %s4080_s18, %s3626_s10 }
  0x66   : > { %p3623_p2 = pnand %p3621_p13, %p4698_p0  ;;  %p3629_p6 = scmp.lt.s32.totalorder %s3627_s23, %s3620_s15 }
  0x68   : > { %p3624_p11 = pneg %p3623_p2  ;;  %p3630_p4 = por %p3629_p6, %p3628_p1 }
  0x6a   : > { %p3631_p8 = pnand %p3630_p4, %p3624_p11 }
  0x6c   : > { %3634 = shalt.err (!%p3631_p8)
}
  0x6d   : > { %s3825_s1 = smov 64   ;;  %s3826_s19 = smov 4  }
  0x6e   : > { %3382 = dma.hbm_to_vmem [thread:$0]  (!%p4084_p12), %s4077_s13, 512, %s4080_s18, %s4088_s16, %s3825_s1, %s3825_s1, %s3826_s19  }
  0x6f   : > { %s4756_s12 = sshll.u32 %s3813_s27, 9  ;;  %s4757_s14 = sld [smem:[#allocation48_spill]] }
  0x70   : > { %s734_s23 = scalar_lea.vmem [#allocation10], %s4069_s11  ;;  %s3827_s5 = smov [#allocation7]  }
  0x71   : > { %s741_s7 = sshll.u32 %s734_s23, 4  ;;  %s614_s8 = sshll.u32 %s3827_s5, 4  ;;  %s4127_s7 = int_to_ptr.vmem [resolvable:$true] %s741_s7  ;;  %s615_s8 = int_to_ptr.vmem [resolvable:$true] %s614_s8 }
  0x72   : > { %s4758_s26 = sld [smem:[#allocation37_spill]]  ;;  %p4760_p1 = pneg %p4020_p7 }
  0x75   : > { %s4124_s10 = scalar_lea.hbm %s4757_s14, %s4756_s12 }
  0x78   : > { %s4759_s0 = smov %s4758_s26  ;;  %s3635_s22 = scalar_lea.hbm %s4758_s26, 16 }
  0x79   : > { %p3636_p11 = scmp.ne.s32.totalorder %s4759_s0, %s3635_s22  ;;  %p3642_p9 = scmp.lt.u32.totalorder %s3635_s22, %s4759_s0 }
  0x7b   : > { %p3638_p5 = pnand %p3636_p11, %p4760_p1 }
  0x7d   : > { %p3639_p3 = pneg %p3638_p5 }
  0x7f   : > { %p3644_p10 = pnand %p3642_p9, %p3639_p3 }
  0x81   : > { %3647 = shalt.err (!%p3644_p10)
}
  0x82   : > { %s3648_s5 = scalar_lea.vmem %s615_s8, 16  ;;  %p4761_p2 = pmov %p4760_p1 }
  0x83   : > { %p3649_p13 = scmp.ne.s32.totalorder %s615_s8, %s3648_s5  ;;  %s3655_s20 = scalar_lea.vmem %s615_s8, 32 }
  0x84   : > { %p3656_p8 = scmp.lt.s32.totalorder %s615_s8, %s615_s8  ;;  %p3657_p0 = scmp.lt.s32.totalorder %s3655_s20, %s3648_s5 }
  0x85   : > { %p3651_p6 = pnand %p3649_p13, %p4761_p2 }
  0x86   : > { %p3658_p12 = por %p3657_p0, %p3656_p8 }
  0x87   : > { %p3652_p4 = pneg %p3651_p6 }
  0x89   : > { %p3659_p1 = pnand %p3658_p12, %p3652_p4 }
  0x8b   : > { %3662 = shalt.err (!%p3659_p1)
}
  0x8c   : > { %3375 = dma.hbm_to_vmem [thread:$0]  (!%p4020_p7), %s4759_s0, 16, %s615_s8, [#allocation6]  }
  0x8d   : > { %s49_s22 = sadd.s32 1, %s3817_s28  ;;  %s56_s29 = sadd.s32 1, %s3801_s25 }
  0x8e   : > { %p4762_p12 = scmp.ne.s32.totalorder %s4747_s17, 0  ;;  %p63_p0 = scmp.ne.s32.totalorder %s3801_s25, %s3797_s2 }
  0x8f   : > { %p69_p11 = scmp.ne.s32.totalorder %s3797_s2, %s3793_s24  ;;  %s625_s21 = sand.u32 1, %s3801_s25  }
  0x90   : > { %s4831_s22 = smov (!%p4762_p12, %s49_s22), %s3817_s28  ;;  %p4763_p3 = scmp.eq.s32.totalorder %s3821_s4, 0 }
  0x91   : > { %p51_p5 = scmp.ge.s32.totalorder %s4831_s22, 2  ;;  %s4764_s11 = sld [smem:[#allocation27_spill]] }
  0x92   : > { %p65_p9 = por %p4763_p3, %p63_p0  ;;  %p4765_p10 = scmp.ne.s32.totalorder %s4741_s30, 0 }
  0x93   : > { %s4833_s22 = smov (%p51_p5, %s4831_s22), 0  ;;  %s2942_s8 = sshll.u32 %s625_s21, 2 }
  0x94   : > { %p4163_p13 = por %p4765_p10, %p69_p11  ;;  %4767 = sst [smem:[#allocation28_spill]] %s4833_s22 }
  0x95   : > { %s53_s17 = ssub.s32 %s3817_s28, %s4833_s22  ;;  %s2943_s24 = sshll.u32 %s3817_s28, 6 }
  0x96   : > { %s4766_s6 = scalar_select %p4163_p13, 1, 0 }
  0x97   : > { %p54_p7 = scmp.eq.s32.totalorder %s53_s17, 0  ;;  %s4768_s15 = sld [smem:[#allocation34_spill]] }
  0x98   : > { %s629_s13 = scalar_lea.vmem [#allocation3], %s2942_s8  ;;  %p4770_p2 = scmp.lt.s32.totalorder %s3821_s4, 4 }
  0x99   : > { %s636_s18 = sshll.u32 %s629_s13, 4  ;;  %s3663_s3 = scalar_lea.hbm %s4124_s10, 512  ;;  %s4182_s18 = int_to_ptr.vmem [resolvable:$true] %s636_s18 }
  0x9a   : > { %s4180_s5 = scalar_select %p54_p7, %s3801_s25, %s56_s29  }
  0x9b   : > { %p4186_p6 = pnand %p4770_p2, %p65_p9  ;;  %p3664_p4 = scmp.ne.s32.totalorder %s4124_s10, %s3663_s3 }
  0x9c   : > { %4769 = sst [smem:[#allocation29_spill]] %s4180_s5  ;;  %p4772_p8 = scmp.ne.s32.totalorder %s4764_s11, 0 }
  0x9d   : > { %s4177_s23 = scalar_lea.hbm %s4768_s15, %s2943_s24  ;;  %s3668_s8 = scalar_lea.hbm %s4757_s14, 1024 }
  0x9e   : > { %p4773_p1 = pneg %p4772_p8  ;;  %p3669_p11 = scmp.lt.u32.totalorder %s4124_s10, %s4757_s14 }
  0x9f   : > { %p3670_p5 = scmp.lt.u32.totalorder %s3668_s8, %s3663_s3  ;;  %p3672_p9 = scmp.lt.u32.totalorder %s3663_s3, %s4124_s10 }
  0xa0   : > { %p3666_p12 = pnand %p3664_p4, %p4773_p1 }
  0xa1   : > { %p3671_p3 = por %p3670_p5, %p3669_p11 }
  0xa2   : > { %p3667_p0 = pneg %p3666_p12 }
  0xa3   : > { %p3673_p10 = por %p3672_p9, %p3671_p3 }
  0xa5   : > { %p3674_p7 = pnand %p3673_p10, %p3667_p0 }
  0xa7   : > { %3677 = shalt.err (!%p3674_p7)
}
  0xa8   : > { %s3678_s12 = scalar_lea.vmem %s4127_s7, 512  ;;  %p4774_p4 = pmov %p4773_p1 }
  0xa9   : > { %p3679_p2 = scmp.ne.s32.totalorder %s4127_s7, %s3678_s12  ;;  %s3828_s9 = smov [#allocation10]  }
  0xaa   : > { %s3683_s13 = sshll.u32 %s3828_s9, 4  ;;  %s3684_s13 = int_to_ptr.vmem [resolvable:$false] %s3683_s13 }
  0xab   : > { %p3681_p1 = pnand %p3679_p2, %p4774_p4  ;;  %s3685_s26 = scalar_lea.vmem %s3684_s13, 1024 }
  0xac   : > { %p3686_p13 = scmp.lt.s32.totalorder %s4127_s7, %s3684_s13  ;;  %p3687_p11 = scmp.lt.s32.totalorder %s3685_s26, %s3678_s12 }
  0xad   : > { %p3682_p12 = pneg %p3681_p1 }
  0xae   : > { %p3688_p5 = por %p3687_p11, %p3686_p13 }
  0xb0   : > { %p3689_p3 = pnand %p3688_p5, %p3682_p12 }
  0xb2   : > { %3692 = shalt.err (!%p3689_p3)
}
  0xb3   : > { %3385 = dma.hbm_to_vmem [thread:$0]  (!%p4772_p8), %s4124_s10, 512, %s4127_s7, %s4088_s16, %s3825_s1, %s3825_s1, %s3826_s19  }
  0xb4   : > { %s626_s3 = scalar_lea.sflag [#allocation4], %s625_s21  ;;  %s3693_s17 = scalar_lea.hbm %s4177_s23, 64 }
  0xb5   : > { %p3694_p13 = scmp.ne.s32.totalorder %s4177_s23, %s3693_s17  ;;  %p3695_p0 = pneg %p4186_p6 }
  0xb6   : > { %s3698_s24 = scalar_lea.hbm %s4768_s15, 128  ;;  %p3699_p7 = scmp.lt.u32.totalorder %s4177_s23, %s4768_s15 }
  0xb7   : > { %p3696_p9 = pnand %p3695_p0, %p3694_p13  ;;  %p3700_p2 = scmp.lt.u32.totalorder %s3698_s24, %s3693_s17 }
  0xb8   : > { %p3702_p4 = scmp.lt.u32.totalorder %s3693_s17, %s4177_s23 }
  0xb9   : > { %p3697_p10 = pneg %p3696_p9  ;;  %p3701_p8 = por %p3700_p2, %p3699_p7 }
  0xbb   : > { %p3703_p1 = por %p3702_p4, %p3701_p8 }
  0xbd   : > { %p3704_p12 = pnand %p3703_p1, %p3697_p10 }
  0xbf   : > { %3707 = shalt.err (!%p3704_p12)
}
  0xc0   : > { %s3708_s7 = scalar_lea.vmem %s4182_s18, 64  ;;  %s3829_s16 = smov [#allocation3]  }
  0xc1   : > { %p3709_p11 = scmp.ne.s32.totalorder %s4182_s18, %s3708_s7  ;;  %s3713_s1 = sshll.u32 %s3829_s16, 4  ;;  %s3714_s1 = int_to_ptr.vmem [resolvable:$false] %s3713_s1 }
  0xc2   : > { %s3715_s19 = scalar_lea.vmem %s3714_s1, 128  ;;  %p3716_p13 = scmp.lt.s32.totalorder %s4182_s18, %s3714_s1 }
  0xc3   : > { %p3711_p5 = pnand %p3709_p11, %p3695_p0  ;;  %p3717_p9 = scmp.lt.s32.totalorder %s3715_s19, %s3708_s7 }
  0xc5   : > { %p3712_p3 = pneg %p3711_p5  ;;  %p3718_p7 = por %p3717_p9, %p3716_p13 }
  0xc7   : > { %p3719_p2 = pnand %p3718_p7, %p3712_p3 }
  0xc9   : > { %3722 = shalt.err (!%p3719_p2)
}
  0xca   : > { %3379 = dma.hbm_to_vmem [thread:$0]  (!%p4186_p6), %s4177_s23, 64, %s4182_s18, %s626_s3  }
  0xcb   : > { %s4775_s10 = sld [smem:[#allocation24_spill]] }
  0xd1   : > { %p4776_p10 = scmp.ne.s32.totalorder %s4775_s10, 0 }
  0xd3   : > { %785 = sbr.rel (%p4776_p10) target bundleno = 5343 (0x14df), region = 100 }
  0xda   : > { %s787_s21 = sand.u32 1, %s3797_s2   ;;  %p4777_p0 = scmp.ne.s32.totalorder %s4766_s6, 0 }
  0xdb   : > { %s4247_s9 = sshll.u32 %s787_s21, 2  ;;  %s788_s13 = scalar_lea.sflag [#allocation4], %s787_s21 }
  0xdc   : > { %3768 = dma.done.wait (%p4777_p0), %s788_s13, 64  }
  0xdd   : > { %3770 = vsyncadd (%p4777_p0), %s788_s13, 4294967232  ;;  %p4778_p8 = scmp.ne.s32.totalorder %s4741_s30, 0 }
  0xdf   : > { %3772 = dma.done.wait (%p4778_p8), [#allocation6], 32  }
  0xe0   : > { %3774 = vsyncadd (%p4778_p8), [#allocation6], 4294967264  ;;  %s4779_s23 = sadd.s32 4294967295, %s3821_s4   ;;  %s4780_s18 = sld [smem:[#allocation14_spill]] }
  0xe1   : > { %s4781_s20 = sld [smem:[#allocation23_spill]]  ;;  %s804_s3 = sand.u32 1, %s4779_s23  }
  0xe2   : > { %s805_s8 = scalar_lea.sflag [#allocation9], %s804_s3 }
  0xe6   : > { %s806_s17 = sand.u32 1, %s4780_s18  }
  0xe7   : > { %s2954_s11 = sshll.u32 %s806_s17, 5  ;;  %p4782_p6 = scmp.ne.s32.totalorder %s4781_s20, 0 }
  0xe8   : > { %s4261_s24 = scalar_lea.vmem [#allocation8], %s2954_s11 }
  0xe9   : > { %3776 = dma.done.wait (%p4782_p6), %s805_s8, 1024  }
  0xea   : > { %3778 = vsyncadd (%p4782_p6), %s805_s8, 4294966272  ;;  %s4783_s6 = sld [smem:[#allocation19_spill]]  ;;  %s4784_s29 = sld [smem:[#allocation18_spill]] }
  0xeb   : > { %s4786_s21 = sld [smem:[#allocation54_spill]]  ;;  %s4788_s3 = sld [smem:[#allocation42_spill]] }
  0xec   : > { %s4789_s0 = sld [smem:[#allocation38_spill]]  ;;  %s4790_s12 = sld [smem:[#allocation39_spill]] }
  0xed   : > { %s4791_s10 = sld [smem:[#allocation40_spill]]  ;;  %s4792_s18 = sld [smem:[#allocation43_spill]] }
  0xee   : > { %s4793_s26 = sld [smem:[#allocation44_spill]]  ;;  %s4794_s22 = sld [smem:[#allocation45_spill]] }
  0xef   : > { %s4795_s16 = sld [smem:[#allocation46_spill]]  ;;  %s4797_s28 = sld [smem:[#allocation47_spill]] }
  0xf0   : > { %p935_p4 = scmp.lt.s32.totalorder %s4783_s6, 1  ;;  %p938_p1 = scmp.lt.s32.totalorder %s4784_s29, 1 }
  0xf1   : > { %s4799_s27 = sld [smem:[#allocation49_spill]]  ;;  %s4801_s8 = sld [smem:[#allocation50_spill]] }
  0xf2   : > { %s4835_s6 = smov (!%p935_p4, %s4783_s6), 1  ;;  %p2964_p12 = scmp.ne.s32.totalorder %s4784_s29, 0 }
  0xf3   : > { %s939_s30 = scalar_select %p938_p1, %s4784_s29, 1 }
  0xf4   : > { %s4281_s13 = scalar_lea.vmem %s4786_s21, %s4835_s6  ;;  %s4805_s4 = scalar_lea.vmem (!%p2964_p12), [#allocation3], %s4247_s9  ;;  %vm1000_vm0 = vcmask (!%p2964_p12), 523264   ;;  %v2965_v12 = vld [vmem:[#allocation5] ss:$0 sm:$0xff] (!%p2964_p12)  ;;  %v2966_v14 = vld [vmem:[#allocation7] ss:$0 sm:$0xff] (!%p2964_p12) }
  0xf5   : > { %4787 = sst [smem:[#allocation30_spill]] %s4281_s13  ;;  %s3059_s23 = sshll.u32 %s939_s30, 5  ;;  %v996_v0 = vld [vmem:[%s4805_s4] sm:$0xf] (!%p2964_p12) }
  0xf6   : > { %s4286_s17 = scalar_lea.vmem %s4788_s3, %s939_s30  ;;  %s4291_s14 = scalar_lea.vmem %s4789_s0, %s3059_s23  ;;  %v997_v1 = vunpack.c.l.bf16 (!%p2964_p12), %v996_v0 }
  0xf7   : > { %s4296_s7 = scalar_lea.vmem %s4790_s12, %s3059_s23  ;;  %s4301_s21 = scalar_lea.vmem %s4791_s10, %s3059_s23 }
  0xf8   : > { %s4306_s20 = scalar_lea.vmem %s4792_s18, %s939_s30  ;;  %s4311_s0 = scalar_lea.vmem %s4793_s26, %s939_s30  ;;  %v1001_v2 = vsel (!%p2964_p12), %vm1000_vm0, %v997_v1, 0.0 }
  0xf9   : > { %s4316_s15 = scalar_lea.vmem %s4794_s22, %s939_s30  ;;  %s4321_s23 = scalar_lea.vmem %s4795_s16, %s939_s30  ;;  %1002 = vadd.xlane.f32.xlu0 (!%p2964_p12), %v1001_v2 }
  0xfa   : > { %4796 = sst [smem:[#allocation31_spill]] %s4321_s23  ;;  %s4326_s1 = scalar_lea.vmem %s4797_s28, %s939_s30 }
  0xfb   : > { %4798 = sst [smem:[#allocation32_spill]] %s4326_s1  ;;  %s4331_s3 = scalar_lea.vmem %s4799_s27, %s939_s30 }
  0xfc   : > { %4800 = sst [smem:[#allocation33_spill]] %s4331_s3  ;;  %s3062_s26 = sshll.u32 %s939_s30, 6 }
  0xfd   : > { %s4336_s22 = scalar_lea.vmem %s4801_s8, %s3062_s26  ;;  %s4802_s12 = sld [smem:[#allocation51_spill]] }
  0xfe   : > { %s4803_s10 = sld [smem:[#allocation52_spill]]  ;;  %s4804_s18 = sld [smem:[#allocation53_spill]] }
  0xff   : > { %s4353_s3 = scalar_lea.vmem [#allocation10], %s2954_s11  ;;  %995 = sbr.rel (%p2964_p12) target bundleno = 562 (0x232), region = 124 }
 0x103   : > { %s4341_s16 = scalar_lea.vmem %s4802_s12, %s939_s30 }
 0x104   : > { %s4346_s28 = scalar_lea.vmem %s4803_s10, %s939_s30  ;;  %s4351_s27 = scalar_lea.vmem %s4804_s18, %s939_s30 }
 0x186   : > { %v1003_v3 = vpop.xlane.xlu0 %1002 }
 0x187   : > { %v1005_v4 = vmul.f32 0.015625, %v1003_v3 }
 0x189   : > { %v1006_v5 = vsub.f32 %v997_v1, %v1005_v4 }
 0x18b   : > { %v1007_v6 = vmul.f32 %v1006_v5, %v1006_v5 }
 0x18d   : > { %v1008_v7 = vsel %vm1000_vm0, %v1007_v6, 0.0 }
 0x18e   : > { %1009 = vadd.xlane.f32.xlu0 %v1008_v7 }
 0x21b   : > { %v1010_v8 = vpop.xlane.xlu0 %1009 }
 0x21c   : > { %v1011_v9 = vmul.f32 0.015625, %v1010_v8 }
 0x21e   : > { %v1012_v10 = vadd.f32 1e-12, %v1011_v9 }
 0x220   : > { %3491 = vrsqrt.f32 %v1012_v10 }
 0x22a   : > { %v3492_v11 = vpop.eup %3491 }
 0x22b   : > { %v1014_v13 = vmul.f32 %v3492_v11, %v1006_v5 }
 0x22d   : > { %v1021_v15 = vmul.f32 %v2965_v12, %v1014_v13 }
 0x22f   : > { %v1028_v16 = vadd.f32 %v2966_v14, %v1021_v15 }
 0x231   : > { %1029 = vst.msk [vmem:[#allocation2] sm:$0xff] %vm1000_vm0, %v1028_v16 }
 0x232 PF: > { %s4806_s29 = sld [smem:[#allocation35_spill]]  ;;  %s4808_s13 = sld [smem:[#allocation18_spill]] }
 0x238   : > { %v4361_v17 = vld [vmem:[#allocation2] sm:$0xff]  ;;  %s4807_s30 = scalar_lea.vmem %s4806_s29, %s4835_s6  ;;  %p2967_p11 = scmp.ge.s32.totalorder %s4808_s13, 1 }
 0x239   : > { %v4368_v18 = vld [vmem:[%s4807_s30] sm:$0x1]  ;;  %v4372_v19 = vpack.c.bf16 %v4361_v17, %v4361_v17  ;;  %v3830_v21 = vmov (!%p2967_p11), 0.0   ;;  %v3494_v22 = vld [vmem:[%s4291_s14 + $0x8] sm:$0xff] (!%p2967_p11)   ;;  %vm3831_vm1 = vmmov (!%p2967_p11), 0   ;;  %v3495_v23 = vld [vmem:[%s4291_s14 + $0x10] sm:$0xff] (!%p2967_p11)   ;;  %v1298_v54 = vlaneseq (!%p2967_p11) }
 0x23a   : > { %1036 = sbr.rel (%p2967_p11) target bundleno = 2951 (0xb87), region = 128  ;;  %v3493_v20 = vld [vmem:[%s4291_s14] sm:$0xff] (!%p2967_p11)   ;;  %3147 = vmatprep.subr.bf16.mxu1 (!%p2967_p11), %v3830_v21  ;;  %3171 = vmatprep.subr.bf16.mxu0 (!%p2967_p11), %v3830_v21  ;;  %v3496_v24 = vld [vmem:[%s4291_s14 + $0x18] sm:$0xff] (!%p2967_p11)   ;;  %vm1076_vm2 = vcmask (!%p2967_p11), 523264   ;;  %v3498_v26 = vld [vmem:[%s4296_s7 + $0x8] sm:$0xff] (!%p2967_p11)   ;;  %vm1303_vm3 = vcmask (!%p2967_p11), 261120  }
 0x23b   : > { %3148 = vmatpush3.bf16.msra.mxu1 (!%p2967_p11), %v3493_v20  ;;  %3155 = vmatprep.mubr.msk.bf16.mxu1 (!%p2967_p11), %vm3831_vm1, %v3830_v21  ;;  %v3497_v25 = vld [vmem:[%s4296_s7] sm:$0xff] (!%p2967_p11)   ;;  %v3499_v27 = vld [vmem:[%s4296_s7 + $0x10] sm:$0xff] (!%p2967_p11)   ;;  %v3500_v28 = vld [vmem:[%s4296_s7 + $0x18] sm:$0xff] (!%p2967_p11)   ;;  %s3832_s6 = smov (!%p2967_p11), 96   ;;  %v1299_v55 = vshrl.u32 (!%p2967_p11), %v1298_v54, 7  ;;  %vm1396_vm4 = vcmask (!%p2967_p11), 64512  }
 0x23c   : > { %3149 = vmatprep.subr.bf16.mxu1 (!%p2967_p11), %v3830_v21  ;;  %3179 = vmatprep.mubr.msk.bf16.mxu0 (!%p2967_p11), %vm3831_vm1, %v3830_v21  ;;  %v2968_v33 = vld [vmem:[%s4286_s17] ss:$0 sm:$0xff] (!%p2967_p11)  ;;  %v3502_v41 = vld [vmem:[%s4301_s21 + $0x8] sm:$0xff] (!%p2967_p11)   ;;  %v3503_v46 = vld [vmem:[%s4301_s21 + $0x10] sm:$0xff] (!%p2967_p11)   ;;  %vm1420_vm5 = vcmask (!%p2967_p11), 1043456   ;;  %s3833_s23 = smov (!%p2967_p11), 32  }
 0x23d   : > { %v2974_v34 = vld [vmem:[%s4306_s20] ss:$0 sm:$0xff] (!%p2967_p11)  ;;  %v3504_v47 = vld [vmem:[%s4301_s21 + $0x18] sm:$0xff] (!%p2967_p11)   ;;  %v1300_v56 = vsub.s32 (!%p2967_p11), 0, %v1299_v55  ;;  %s4809_s1 = sld [smem:[#allocation31_spill]] (!%p2967_p11)  ;;  %s4810_s26 = sld [smem:[#allocation32_spill]] (!%p2967_p11) }
 0x23e   : > { %v3501_v36 = vld [vmem:[%s4301_s21] sm:$0xff] (!%p2967_p11)   ;;  %s4811_s5 = sld [smem:[#allocation33_spill]] (!%p2967_p11) }
 0x23f   : > { %3150 = vmatpush3.bf16.msra.mxu1 (!%p2967_p11), %v3494_v22  ;;  %3172 = vmatpush3.bf16.msra.mxu0 (!%p2967_p11), %v3501_v36  ;;  %v1301_v57 = vrot.slane (!%p2967_p11), %v4368_v18, %v1300_v56  ;;  %v2980_v0 = vld [vmem:[%s4311_s0] ss:$0 sm:$0xff] (!%p2967_p11) }
 0x240   : > { %3151 = vmatprep.subr.bf16.mxu1 (!%p2967_p11), %v3830_v21  ;;  %3173 = vmatprep.subr.bf16.mxu0 (!%p2967_p11), %v3830_v21  ;;  %v2990_v54 = vld [vmem:[%s4316_s15] ss:$0 sm:$0xff] (!%p2967_p11) }
 0x243   : > { %3152 = vmatpush3.bf16.msra.mxu1 %v3495_v23  ;;  %3174 = vmatpush3.bf16.msra.mxu0 %v3502_v41  ;;  %v3508_v41 = vld [vmem:[%s4261_s24 + $0x18] sm:$0xff]  }
 0x244   : > { %3153 = vmatprep.subr.bf16.mxu1 %v3830_v21  ;;  %3175 = vmatprep.subr.bf16.mxu0 %v3830_v21 }
 0x247   : > { %3154 = vmatpush3.bf16.msra.mxu1 %v3496_v24  ;;  %3176 = vmatpush3.bf16.msra.mxu0 %v3503_v46 }
 0x248   : > { %3159 = vmatprep.subr.bf16.mxu1 %v3830_v21  ;;  %3177 = vmatprep.subr.bf16.mxu0 %v3830_v21 }
 0x24a   : > { %3156 = vmatmul.mubr.msk.bf16.vlgmr.msra.gmra.mrb[0].mxu1 %vm1076_vm2, %v4372_v19 }
 0x24b   : > { %3160 = vmatpush3.bf16.msra.mxu1 %v3497_v25  ;;  %3167 = vmatprep.mubr.msk.bf16.mxu1 %vm3831_vm1, %v3830_v21 }
 0x24c   : > { %3161 = vmatprep.subr.bf16.mxu1 %v3830_v21  ;;  %3178 = vmatpush3.bf16.msra.mxu0 %v3504_v47 }
 0x24d   : > { %3195 = vmatprep.subr.bf16.mxu0 %v3830_v21 }
 0x24f   : > { %3162 = vmatpush3.bf16.msra.mxu1 %v3498_v26  ;;  %3180 = vmatmul.mubr.msk.bf16.vlgmr.msra.gmra.mrb[0].mxu0 %vm1076_vm2, %v4372_v19 }
 0x250   : > { %3163 = vmatprep.subr.bf16.mxu1 %v3830_v21  ;;  %3197 = vmatprep.mubr.msk.bf16.mxu0 %vm3831_vm1, %v3830_v21 }
 0x253   : > { %3164 = vmatpush3.bf16.msra.mxu1 %v3499_v27 }
 0x254   : > { %3165 = vmatprep.subr.bf16.mxu1 %v3830_v21 }
 0x257   : > { %3166 = vmatpush3.bf16.msra.mxu1 %v3500_v28 }
 0x258   : > { %3183 = vmatprep.subr.bf16.mxu1 %v3830_v21 }
 0x25a   : > { %3168 = vmatmul.mubr.msk.bf16.vlgmr.msra.gmra.mrb[4].mxu1 %vm1076_vm2, %v4372_v19 }
 0x25b   : > { %3185 = vmatprep.mubr.msk.bf16.mxu1 %vm3831_vm1, %v3830_v21 }
 0x31d   : > { %v1114_v29 = vpop.f32.mrb[0].mxu1 }
 0x31e   : > { %v3157_v30 = vpop.f32.mrb[1].mxu1  ;;  %v1115_v37 = vadd.f32 %v2968_v33, %v1114_v29  ;;  %v3505_v33 = vld [vmem:[%s4261_s24] sm:$0xff]  }
 0x31f   : > { %v1117_v31 = vpop.f32.mrb[2].mxu1 }
 0x320   : > { %v3158_v32 = vpop.f32.mrb[3].mxu1  ;;  %v1120_v44 = vmul.f32 0.17677669, %v1115_v37 }
 0x322   : > { %v1283_v48 = vpack.c.bf16 %v1120_v44, %v1120_v44  ;;  %v1273_v1 = vpop.f32.mrb[0].mxu0 }
 0x323   : > { %v1274_v2 = vadd.f32 %v2980_v0, %v1273_v1  ;;  %v3181_v3 = vpop.f32.mrb[1].mxu0 }
 0x324   : > { %v1276_v4 = vpop.f32.mrb[2].mxu0  ;;  %v3509_v3 = vld [vmem:[%s4353_s3] sm:$0xff]  }
 0x325   : > { %v1295_v5 = vpack.c.bf16 %v1274_v2, %v1274_v2  ;;  %v3182_v6 = vpop.f32.mrb[3].mxu0  ;;  %v3510_v4 = vld [vmem:[%s4353_s3 + $0x8] sm:$0xff]  }
 0x326   : > { %v3512_v6 = vld [vmem:[%s4353_s3 + $0x18] sm:$0xff]  }
 0x327   : > { %v1422_v7 = vsel %vm1420_vm5, %v1295_v5, 0  ;;  %v3511_v5 = vld [vmem:[%s4353_s3 + $0x10] sm:$0xff]  }
 0x328   : > { %3196 = vmatpush3.bf16.msra.mxu0 %v1422_v7 }
 0x329   : > { %3207 = vmatprep.subr.bf16.mxu0 %v3830_v21 }
 0x32d   : > { %v1194_v35 = vpop.f32.mrb[4].mxu1 }
 0x32e   : > { %v1195_v38 = vadd.f32 %v2974_v34, %v1194_v35  ;;  %v3169_v39 = vpop.f32.mrb[5].mxu1  ;;  %v3506_v34 = vld [vmem:[%s4261_s24 + $0x8] sm:$0xff]   ;;  %v3507_v35 = vld [vmem:[%s4261_s24 + $0x10] sm:$0xff]  }
 0x32f   : > { %v1197_v40 = vpop.f32.mrb[6].mxu1 }
 0x330   : > { %v1289_v42 = vpack.c.bf16 %v1195_v38, %v1195_v38  ;;  %1286 = vrot.lane.b32.xlu0 %v1195_v38, %s3832_s6  ;;  %v3170_v43 = vpop.f32.mrb[7].mxu1 }
 0x332   : > { %v1308_v45 = vsel %vm1303_vm3, %v1289_v42, 0 }
 0x333   : > { %3184 = vmatpush3.bf16.xpose.msra.mxu1 %v1308_v45 }
 0x334   : > { %1280 = vrot.lane.b32.xlu0 %v1120_v44, %s3832_s6  ;;  %3189 = vmatprep.subr.bf16.mxu1 %v3830_v21 }
 0x33a   : > { %3186 = vmatmul.mubr.msk.bf16.vlgmr.msra.gmra.mrb[8].mxu1 %vm1303_vm3, %v1283_v48 }
 0x33b   : > { %3191 = vmatprep.mubr.msk.bf16.mxu1 %vm3831_vm1, %v3830_v21 }
 0x3a2   : > { %v1287_v49 = vpop.permute.xlu0 %1286 }
 0x3a3   : > { %v1290_v50 = vpack.c.bf16 %v1287_v49, %v1287_v49 }
 0x3a5   : > { %v1354_v51 = vsel %vm1303_vm3, %v1290_v50, 0 }
 0x3a6   : > { %3190 = vmatpush3.bf16.xpose.msra.mxu1 %v1354_v51  ;;  %v1281_v52 = vpop.permute.xlu0 %1280 }
 0x3a7   : > { %3201 = vmatprep.subr.bf16.mxu1 %v3830_v21  ;;  %v1284_v53 = vpack.c.bf16 %v1281_v52, %v1281_v52 }
 0x3ad   : > { %3192 = vmatmul.mubr.msk.bf16.vlgmr.msra.gmra.mrb[12].mxu1 %vm1303_vm3, %v1284_v53 }
 0x3ae   : > { %3203 = vmatprep.mubr.msk.bf16.mxu1 %vm3831_vm1, %v3830_v21 }
 0x40d   : > { %v1344_v58 = vpop.f32.mrb[8].mxu1 }
 0x40e   : > { %v1345_v59 = vadd.f32 %v1344_v58, %v1301_v57  ;;  %v3187_v60 = vpop.f32.mrb[9].mxu1 }
 0x40f   : > { %v1347_v61 = vpop.f32.mrb[10].mxu1 }
 0x410   : > { %v3188_v62 = vpop.f32.mrb[11].mxu1  ;;  %v1397_v63 = vsel %vm1396_vm4, %v1345_v59, -inf }
 0x411   : > { %1398 = vmax.xlane.f32.xlu0 %v1397_v63 }
 0x480   : > { %v1390_v8 = vpop.f32.mrb[12].mxu1 }
 0x481   : > { %v1391_v9 = vadd.f32 %v1390_v8, %v1301_v57  ;;  %v3193_v10 = vpop.f32.mrb[13].mxu1 }
 0x482   : > { %v1393_v11 = vpop.f32.mrb[14].mxu1 }
 0x483   : > { %v3194_v12 = vpop.f32.mrb[15].mxu1  ;;  %v1400_v13 = vsel %vm1396_vm4, %v1391_v9, -inf  ;;  %v2996_v11 = vld [vmem:[%s4809_s1] ss:$0 sm:$0xff] }
 0x484   : > { %1401 = vmax.xlane.f32.xlu1 %v1400_v13  ;;  %v2997_v13 = vld [vmem:[%s4810_s26] ss:$0 sm:$0xff] }
 0x495   : > { %1292 = vrot.lane.b32.xlu1 %v1274_v2, %s3832_s6 }
 0x49e   : > { %v1399_v14 = vpop.xlane.xlu0 %1398 }
 0x49f   : > { %v1403_v15 = vsub.f32 %v1345_v59, %v1399_v14 }
 0x4a1   : > { %v1405_v16 = vmul.f32 1.442695, %v1403_v15 }
 0x4a3   : > { %3521 = vpow2.f32 %v1405_v16 }
 0x4ad   : > { %v3522_v20 = vpop.eup %3521 }
 0x4ae   : > { %v1409_v22 = vsel %vm1396_vm4, %v3522_v20, 0.0  ;;  %v1415_v23 = vpack.c.bf16 %v3522_v20, %v3522_v20  ;;  %v3513_v20 = vld [vmem:[%s4336_s22] sm:$0xff]  }
 0x4af   : > { %1410 = vadd.xlane.f32.xlu0 %v1409_v22  ;;  %v3514_v22 = vld [vmem:[%s4336_s22 + $0x8] sm:$0xff]  }
 0x4b0   : > { %3198 = vmatmul.mubr.msk.bf16.vlgmr.msra.gmra.mrb[4].mxu0 %vm1396_vm4, %v1415_v23  ;;  %v3515_v23 = vld [vmem:[%s4336_s22 + $0x10] sm:$0xff]  }
 0x4b1   : > { %3215 = vmatprep.mubr.msk.bf16.mxu0 %vm3831_vm1, %v3830_v21  ;;  %3208 = vmatpush3.bf16.msra.mxu0 %v3505_v33 }
 0x4b2   : > { %3209 = vmatprep.subr.bf16.mxu0 %v3830_v21 }
 0x4b5   : > { %3210 = vmatpush3.bf16.msra.mxu0 %v3506_v34 }
 0x4b6   : > { %3211 = vmatprep.subr.bf16.mxu0 %v3830_v21 }
 0x4b9   : > { %3212 = vmatpush3.bf16.msra.mxu0 %v3507_v35 }
 0x4ba   : > { %3213 = vmatprep.subr.bf16.mxu0 %v3830_v21 }
 0x4bd   : > { %3214 = vmatpush3.bf16.msra.mxu0 %v3508_v41 }
 0x4be   : > { %3231 = vmatprep.subr.bf16.mxu0 %v3830_v21 }
 0x511   : > { %v1402_v24 = vpop.xlane.xlu1 %1401 }
 0x512   : > { %v1404_v25 = vsub.f32 %v1391_v9, %v1402_v24  ;;  %v3516_v24 = vld [vmem:[%s4336_s22 + $0x18] sm:$0xff]  }
 0x514   : > { %v1407_v26 = vmul.f32 1.442695, %v1404_v25  ;;  %v3517_v25 = vld [vmem:[%s4336_s22 + $0x20] sm:$0xff]  }
 0x515   : > { %v1293_v27 = vpop.permute.xlu1 %1292 }
 0x516   : > { %3523 = vpow2.f32 %v1407_v26  ;;  %v1296_v28 = vpack.c.bf16 %v1293_v27, %v1293_v27  ;;  %v3518_v26 = vld [vmem:[%s4336_s22 + $0x28] sm:$0xff]   ;;  %v3519_v27 = vld [vmem:[%s4336_s22 + $0x30] sm:$0xff]  }
 0x518   : > { %v1468_v29 = vsel %vm1420_vm5, %v1296_v28, 0  ;;  %v3520_v28 = vld [vmem:[%s4336_s22 + $0x38] sm:$0xff]  }
 0x519   : > { %3202 = vmatpush3.bf16.msra.mxu1 %v1468_v29  ;;  %v2998_v29 = vld [vmem:[%s4811_s5] ss:$0 sm:$0xff] }
 0x51a   : > { %3219 = vmatprep.subr.bf16.mxu1 %v3830_v21 }
 0x520   : > { %v3524_v30 = vpop.eup %3523 }
 0x521   : > { %v1412_v31 = vsel %vm1396_vm4, %v3524_v30, 0.0  ;;  %v1416_v32 = vpack.c.bf16 %v3524_v30, %v3524_v30 }
 0x522   : > { %1413 = vadd.xlane.f32.xlu1 %v1412_v31 }
 0x523   : > { %3204 = vmatmul.mubr.msk.bf16.vlgmr.msra.gmra.mrb[16].mxu1 %vm1396_vm4, %v1416_v32 }
 0x524   : > { %3227 = vmatprep.mubr.msk.bf16.mxu1 %vm3831_vm1, %v3830_v21  ;;  %3220 = vmatpush3.bf16.msra.mxu1 %v3509_v3 }
 0x525   : > { %3221 = vmatprep.subr.bf16.mxu1 %v3830_v21 }
 0x528   : > { %3222 = vmatpush3.bf16.msra.mxu1 %v3510_v4 }
 0x529   : > { %3223 = vmatprep.subr.bf16.mxu1 %v3830_v21 }
 0x52c   : > { %3224 = vmatpush3.bf16.msra.mxu1 %v3511_v5 }
 0x52d   : > { %3225 = vmatprep.subr.bf16.mxu1 %v3830_v21 }
 0x530   : > { %3226 = vmatpush3.bf16.msra.mxu1 %v3512_v6 }
 0x53c   : > { %v1411_v48 = vpop.xlane.xlu0 %1410 }
 0x583   : > { %v1458_v36 = vpop.f32.mrb[4].mxu0 }
 0x584   : > { %v3199_v37 = vpop.f32.mrb[5].mxu0 }
 0x585   : > { %v1461_v38 = vpop.f32.mrb[6].mxu0 }
 0x586   : > { %v3200_v39 = vpop.f32.mrb[7].mxu0 }
 0x5af   : > { %v1414_v40 = vpop.xlane.xlu1 %1413 }
 0x5b0   : > { %3525 = vrcp.f32 %v1414_v40 }
 0x5b1   : > { %3527 = vrcp.f32 %v1411_v48 }
 0x5ba   : > { %v3526_v42 = vpop.eup %3525 }
 0x5bb   : > { %v3528_v49 = vpop.eup %3527 }
 0x5bc   : > { %v1512_v50 = vmul.f32 %v3528_v49, %v1458_v36 }
 0x5f6   : > { %v1504_v43 = vpop.f32.mrb[16].mxu1 }
 0x5f7   : > { %v1513_v44 = vmul.f32 %v3526_v42, %v1504_v43  ;;  %v3205_v45 = vpop.f32.mrb[17].mxu1 }
 0x5f8   : > { %v1507_v46 = vpop.f32.mrb[18].mxu1 }
 0x5f9   : > { %1515 = vrot.lane.b32.xlu0 %v1513_v44, %s3833_s23  ;;  %v3206_v47 = vpop.f32.mrb[19].mxu1 }
 0x66b   : > { %v1516_v51 = vpop.permute.xlu0 %1515 }
 0x66c   : > { %v1518_v52 = vsel %vm1303_vm3, %v1512_v50, %v1516_v51 }
 0x66d   : > { %v1519_v53 = vpack.c.bf16 %v1518_v52, %v1518_v52 }
 0x66f   : > { %3216 = vmatmul.mubr.msk.bf16.vlgmr.msra.gmra.mrb[8].mxu0 %vm1076_vm2, %v1519_v53 }
 0x670   : > { %3247 = vmatprep.mubr.msk.bf16.mxu0 %vm3831_vm1, %v3830_v21  ;;  %3232 = vmatpush3.bf16.msra.mxu0 %v3513_v20 }
 0x671   : > { %3233 = vmatprep.subr.bf16.mxu0 %v3830_v21 }
 0x674   : > { %3234 = vmatpush3.bf16.msra.mxu0 %v3514_v22 }
 0x675   : > { %3235 = vmatprep.subr.bf16.mxu0 %v3830_v21 }
 0x678   : > { %3236 = vmatpush3.bf16.msra.mxu0 %v3515_v23 }
 0x679   : > { %3237 = vmatprep.subr.bf16.mxu0 %v3830_v21 }
 0x67c   : > { %3238 = vmatpush3.bf16.msra.mxu0 %v3516_v24 }
 0x67d   : > { %3239 = vmatprep.subr.bf16.mxu0 %v3830_v21 }
 0x680   : > { %3240 = vmatpush3.bf16.msra.mxu0 %v3517_v25 }
 0x681   : > { %3241 = vmatprep.subr.bf16.mxu0 %v3830_v21 }
 0x684   : > { %3242 = vmatpush3.bf16.msra.mxu0 %v3518_v26 }
 0x685   : > { %3243 = vmatprep.subr.bf16.mxu0 %v3830_v21 }
 0x688   : > { %3244 = vmatpush3.bf16.msra.mxu0 %v3519_v27 }
 0x689   : > { %3245 = vmatprep.subr.bf16.mxu0 %v3830_v21  ;;  %v3004_v21 = vld [vmem:[%s4341_s16] ss:$0 sm:$0xff] }
 0x68c   : > { %3246 = vmatpush3.bf16.msra.mxu0 %v3520_v28 }
 0x742   : > { %v1596_v55 = vpop.f32.mrb[8].mxu0 }
 0x743   : > { %v1597_v56 = vadd.f32 %v2990_v54, %v1596_v55  ;;  %v3217_v57 = vpop.f32.mrb[9].mxu0 }
 0x744   : > { %v1599_v58 = vpop.f32.mrb[10].mxu0 }
 0x745   : > { %v1602_v59 = vadd.f32 %v1597_v56, %v4361_v17  ;;  %v3218_v60 = vpop.f32.mrb[11].mxu0 }
 0x747   : > { %v1605_v61 = vsel %vm1076_vm2, %v1602_v59, 0.0 }
 0x748   : > { %1606 = vadd.xlane.f32.xlu1 %v1605_v61  ;;  %v3013_v61 = vld [vmem:[%s4346_s28] ss:$0 sm:$0xff] }
 0x7d5   : > { %v1607_v62 = vpop.xlane.xlu1 %1606 }
 0x7d6   : > { %v1609_v63 = vmul.f32 0.015625, %v1607_v62 }
 0x7d8   : > { %v1610_v0 = vsub.f32 %v1602_v59, %v1609_v63  ;;  %v3014_v63 = vld [vmem:[%s4351_s27] ss:$0 sm:$0xff] }
 0x7da   : > { %v1611_v1 = vmul.f32 %v1610_v0, %v1610_v0 }
 0x7dc   : > { %v1612_v2 = vsel %vm1076_vm2, %v1611_v1, 0.0 }
 0x7dd   : > { %1613 = vadd.xlane.f32.xlu1 %v1612_v2 }
 0x86a   : > { %v1614_v7 = vpop.xlane.xlu1 %1613 }
 0x86b   : > { %v1615_v8 = vmul.f32 0.015625, %v1614_v7 }
 0x86d   : > { %v1616_v9 = vadd.f32 1e-12, %v1615_v8 }
 0x86f   : > { %3529 = vrsqrt.f32 %v1616_v9 }
 0x879   : > { %v3530_v10 = vpop.eup %3529 }
 0x87a   : > { %v1618_v12 = vmul.f32 %v3530_v10, %v1610_v0 }
 0x87c   : > { %v1625_v14 = vmul.f32 %v2996_v11, %v1618_v12 }
 0x87e   : > { %v1632_v15 = vadd.f32 %v2997_v13, %v1625_v14 }
 0x880   : > { %v1633_v16 = vpack.c.bf16 %v1632_v15, %v1632_v15 }
 0x882   : > { %3228 = vmatmul.mubr.msk.bf16.vlgmr.msra.gmra.mrb[20].mxu1 %vm1076_vm2, %v1633_v16 }
 0x955   : > { %v1710_v30 = vpop.f32.mrb[20].mxu1 }
 0x956   : > { %v1711_v31 = vadd.f32 %v2998_v29, %v1710_v30  ;;  %v3229_v32 = vpop.f32.mrb[21].mxu1 }
 0x957   : > { %v1713_v33 = vpop.f32.mrb[22].mxu1 }
 0x958   : > { %v1716_v34 = vmul.f32 %v1711_v31, %v1711_v31  ;;  %v3230_v35 = vpop.f32.mrb[23].mxu1 }
 0x95a   : > { %v1717_v36 = vmul.f32 %v1716_v34, %v1711_v31 }
 0x95c   : > { %v1718_v37 = vmul.f32 0.044715, %v1717_v36 }
 0x95e   : > { %v1719_v38 = vadd.f32 %v1718_v37, %v1711_v31 }
 0x960   : > { %v1720_v39 = vmul.f32 0.7978846, %v1719_v38 }
 0x962   : > { %3531 = vtanh.f32 %v1720_v39 }
 0x96c   : > { %v3532_v40 = vpop.eup %3531 }
 0x96d   : > { %v1722_v41 = vadd.f32 1.0, %v3532_v40 }
 0x96f   : > { %v1723_v42 = vmul.f32 0.5, %v1722_v41 }
 0x971   : > { %v1724_v43 = vmul.f32 %v1723_v42, %v1711_v31 }
 0x973   : > { %v1725_v44 = vpack.c.bf16 %v1724_v43, %v1724_v43 }
 0x975   : > { %3248 = vmatmul.mubr.bf16.vlgmr.msra.gmra.mrb[12].mxu0 %v1725_v44 }
 0xa48   : > { %v1831_v45 = vpop.f32.mrb[12].mxu0 }
 0xa49   : > { %v1832_v46 = vadd.f32 %v3004_v21, %v1831_v45  ;;  %v3249_v47 = vpop.f32.mrb[13].mxu0 }
 0xa4a   : > { %v1834_v48 = vpop.f32.mrb[14].mxu0 }
 0xa4b   : > { %v3250_v49 = vpop.f32.mrb[15].mxu0  ;;  %v1837_v50 = vadd.f32 %v1832_v46, %v1632_v15 }
 0xa4d   : > { %v1840_v51 = vsel %vm1076_vm2, %v1837_v50, 0.0 }
 0xa4e   : > { %1841 = vadd.xlane.f32.xlu0 %v1840_v51 }
 0xadb   : > { %v1842_v52 = vpop.xlane.xlu0 %1841 }
 0xadc   : > { %v1843_v53 = vmul.f32 0.015625, %v1842_v52 }
 0xade   : > { %v1844_v54 = vsub.f32 %v1837_v50, %v1843_v53 }
 0xae0   : > { %v1845_v55 = vmul.f32 %v1844_v54, %v1844_v54 }
 0xae2   : > { %v1846_v56 = vsel %vm1076_vm2, %v1845_v55, 0.0 }
 0xae3   : > { %1847 = vadd.xlane.f32.xlu1 %v1846_v56 }
 0xb70   : > { %v1848_v57 = vpop.xlane.xlu1 %1847 }
 0xb71   : > { %v1849_v58 = vmul.f32 0.015625, %v1848_v57 }
 0xb73   : > { %v1850_v59 = vadd.f32 1e-12, %v1849_v58 }
 0xb75   : > { %3533 = vrsqrt.f32 %v1850_v59 }
 0xb7f   : > { %v3534_v60 = vpop.eup %3533 }
 0xb80   : > { %v1852_v62 = vmul.f32 %v3534_v60, %v1844_v54 }
 0xb82   : > { %v1859_v0 = vmul.f32 %v3013_v61, %v1852_v62 }
 0xb84   : > { %v1866_v1 = vadd.f32 %v3014_v63, %v1859_v0 }
 0xb86   : > { %1867 = vst.msk [vmem:[#allocation2] sm:$0xff] %vm1076_vm2, %v1866_v1 }
 0xb87 PF: > { %s4812_s8 = sld [smem:[#allocation18_spill]] }
 0xb8d   : > { %p3015_p5 = scmp.ne.s32.totalorder %s4812_s8, 1 }
 0xb8e   : > { %v3535_v2 = vld [vmem:[%s4291_s14] sm:$0xff] (!%p3015_p5)   ;;  %v3834_v3 = vmov (!%p3015_p5), 0.0   ;;  %v3536_v4 = vld [vmem:[%s4291_s14 + $0x8] sm:$0xff] (!%p3015_p5)   ;;  %vm3835_vm6 = vmmov (!%p3015_p5), 0   ;;  %v3537_v5 = vld [vmem:[%s4291_s14 + $0x10] sm:$0xff] (!%p3015_p5)   ;;  %vm1905_vm7 = vcmask (!%p3015_p5), 523264  }
 0xb8f   : > { %1871 = sbr.rel (%p3015_p5) target bundleno = 5343 (0x14df), region = 132  ;;  %3251 = vmatprep.subr.bf16.mxu1 (!%p3015_p5), %v3834_v3  ;;  %3275 = vmatprep.subr.bf16.mxu0 (!%p3015_p5), %v3834_v3  ;;  %v3538_v6 = vld [vmem:[%s4291_s14 + $0x18] sm:$0xff] (!%p3015_p5)   ;;  %v3539_v7 = vld [vmem:[%s4296_s7] sm:$0xff] (!%p3015_p5)   ;;  %v3540_v8 = vld [vmem:[%s4296_s7 + $0x8] sm:$0xff] (!%p3015_p5)   ;;  %vm2126_vm8 = vcmask (!%p3015_p5), 261120   ;;  %s3836_s14 = smov (!%p3015_p5), 96  }
 0xb90   : > { %3252 = vmatpush3.bf16.msra.mxu1 (!%p3015_p5), %v3535_v2  ;;  %3259 = vmatprep.mubr.msk.bf16.mxu1 (!%p3015_p5), %vm3835_vm6, %v3834_v3  ;;  %v3541_v9 = vld [vmem:[%s4296_s7 + $0x10] sm:$0xff] (!%p3015_p5)   ;;  %v3542_v10 = vld [vmem:[%s4296_s7 + $0x18] sm:$0xff] (!%p3015_p5)   ;;  %v1880_v15 = vld [vmem:[%s4286_s17] sm:$0x1] (!%p3015_p5)  ;;  %vm2219_vm9 = vcmask (!%p3015_p5), 57344   ;;  %vm2244_vm10 = vcmask (!%p3015_p5), 1043456  }
 0xb91   : > { %3253 = vmatprep.subr.bf16.mxu1 (!%p3015_p5), %v3834_v3  ;;  %3283 = vmatprep.mubr.msk.bf16.mxu0 (!%p3015_p5), %vm3835_vm6, %v3834_v3  ;;  %v3021_v16 = vld [vmem:[%s4306_s20] ss:$0 sm:$0xff] (!%p3015_p5)  ;;  %v3544_v27 = vld [vmem:[%s4301_s21 + $0x8] sm:$0xff] (!%p3015_p5)   ;;  %v3545_v32 = vld [vmem:[%s4301_s21 + $0x10] sm:$0xff] (!%p3015_p5)   ;;  %vm2240_vm11 = vcmask (!%p3015_p5), 64512   ;;  %s3837_s17 = smov (!%p3015_p5), 32  }
 0xb92   : > { %v3543_v22 = vld [vmem:[%s4301_s21] sm:$0xff] (!%p3015_p5)   ;;  %v3546_v33 = vld [vmem:[%s4301_s21 + $0x18] sm:$0xff] (!%p3015_p5)   ;;  %vm2423_vm12 = vcmask (!%p3015_p5), 516096   ;;  %s4814_s7 = sld [smem:[#allocation32_spill]] (!%p3015_p5)  ;;  %s4815_s21 = sld [smem:[#allocation33_spill]] (!%p3015_p5) }
 0xb93   : > { %3276 = vmatpush3.bf16.msra.mxu0 (!%p3015_p5), %v3543_v22  ;;  %v3027_v21 = vld [vmem:[%s4311_s0] ss:$0 sm:$0xff] (!%p3015_p5)  ;;  %s4816_s20 = sld [smem:[#allocation30_spill]] (!%p3015_p5)  ;;  %vm2652_vm13 = vsmask.f32 (!%p3015_p5), 256 }
 0xb94   : > { %3254 = vmatpush3.bf16.msra.mxu1 (!%p3015_p5), %v3536_v4  ;;  %3277 = vmatprep.subr.bf16.mxu0 (!%p3015_p5), %v3834_v3  ;;  %vm2653_vm14 = vmand (!%p3015_p5), %vm2423_vm12, %vm2652_vm13 }
 0xb95   : > { %3255 = vmatprep.subr.bf16.mxu1 (!%p3015_p5), %v3834_v3 }
 0xb97   : > { %3278 = vmatpush3.bf16.msra.mxu0 %v3544_v27 }
 0xb98   : > { %3256 = vmatpush3.bf16.msra.mxu1 %v3537_v5  ;;  %3279 = vmatprep.subr.bf16.mxu0 %v3834_v3 }
 0xb99   : > { %3257 = vmatprep.subr.bf16.mxu1 %v3834_v3 }
 0xb9b   : > { %3280 = vmatpush3.bf16.msra.mxu0 %v3545_v32 }
 0xb9c   : > { %3258 = vmatpush3.bf16.msra.mxu1 %v3538_v6  ;;  %3281 = vmatprep.subr.bf16.mxu0 %v3834_v3 }
 0xb9d   : > { %3263 = vmatprep.subr.bf16.mxu1 %v3834_v3 }
 0xb9f   : > { %3260 = vmatmul.mubr.msk.bf16.vlgmr.msra.gmra.mrb[0].mxu1 %vm1905_vm7, %v4372_v19  ;;  %3282 = vmatpush3.bf16.msra.mxu0 %v3546_v33 }
 0xba0   : > { %3264 = vmatpush3.bf16.msra.mxu1 %v3539_v7  ;;  %3271 = vmatprep.mubr.msk.bf16.mxu1 %vm3835_vm6, %v3834_v3 }
 0xba1   : > { %3265 = vmatprep.subr.bf16.mxu1 %v3834_v3  ;;  %3299 = vmatprep.subr.bf16.mxu0 %v3834_v3 }
 0xba2   : > { %3284 = vmatmul.mubr.msk.bf16.vlgmr.msra.gmra.mrb[0].mxu0 %vm1905_vm7, %v4372_v19 }
 0xba3   : > { %3301 = vmatprep.mubr.msk.bf16.mxu0 %vm3835_vm6, %v3834_v3 }
 0xba4   : > { %3266 = vmatpush3.bf16.msra.mxu1 %v3540_v8 }
 0xba5   : > { %3267 = vmatprep.subr.bf16.mxu1 %v3834_v3 }
 0xba8   : > { %3268 = vmatpush3.bf16.msra.mxu1 %v3541_v9  ;;  %v3547_v9 = vld [vmem:[%s4261_s24] sm:$0xff]  }
 0xba9   : > { %3269 = vmatprep.subr.bf16.mxu1 %v3834_v3 }
 0xbac   : > { %3270 = vmatpush3.bf16.msra.mxu1 %v3542_v10  ;;  %v3548_v10 = vld [vmem:[%s4261_s24 + $0x8] sm:$0xff]  }
 0xbad   : > { %3287 = vmatprep.subr.bf16.mxu1 %v3834_v3 }
 0xbaf   : > { %3272 = vmatmul.mubr.msk.bf16.vlgmr.msra.gmra.mrb[4].mxu1 %vm1905_vm7, %v4372_v19 }
 0xbb0   : > { %3289 = vmatprep.mubr.msk.bf16.mxu1 %vm3835_vm6, %v3834_v3 }
 0xc72   : > { %v1943_v11 = vpop.f32.mrb[0].mxu1 }
 0xc73   : > { %v3261_v12 = vpop.f32.mrb[1].mxu1  ;;  %v1944_v23 = vadd.f32 %v1943_v11, %v1880_v15  ;;  %v3549_v11 = vld [vmem:[%s4261_s24 + $0x10] sm:$0xff]  }
 0xc74   : > { %v1946_v13 = vpop.f32.mrb[2].mxu1 }
 0xc75   : > { %v3262_v14 = vpop.f32.mrb[3].mxu1  ;;  %v1949_v30 = vmul.f32 0.17677669, %v1944_v23  ;;  %v2102_v45 = vpop.f32.mrb[0].mxu0 }
 0xc76   : > { %v2103_v46 = vadd.f32 %v3027_v21, %v2102_v45  ;;  %v3285_v47 = vpop.f32.mrb[1].mxu0  ;;  %v3551_v45 = vld [vmem:[%s4353_s3] sm:$0xff]  }
 0xc77   : > { %v2112_v34 = vpack.c.bf16 %v1949_v30, %v1949_v30  ;;  %v2105_v48 = vpop.f32.mrb[2].mxu0  ;;  %v3554_v47 = vld [vmem:[%s4353_s3 + $0x18] sm:$0xff]  }
 0xc78   : > { %v2124_v49 = vpack.c.bf16 %v2103_v46, %v2103_v46  ;;  %v3286_v50 = vpop.f32.mrb[3].mxu0 }
 0xc7a   : > { %v2246_v51 = vsel %vm2244_vm10, %v2124_v49, 0 }
 0xc7b   : > { %3300 = vmatpush3.bf16.msra.mxu0 %v2246_v51 }
 0xc7c   : > { %3311 = vmatprep.subr.bf16.mxu0 %v3834_v3 }
 0xc82   : > { %v2023_v20 = vpop.f32.mrb[4].mxu1 }
 0xc83   : > { %v2024_v24 = vadd.f32 %v3021_v16, %v2023_v20  ;;  %v3273_v25 = vpop.f32.mrb[5].mxu1  ;;  %v3550_v20 = vld [vmem:[%s4261_s24 + $0x18] sm:$0xff]   ;;  %s4813_s24 = sld [smem:[#allocation31_spill]] }
 0xc84   : > { %v2026_v26 = vpop.f32.mrb[6].mxu1 }
 0xc85   : > { %v2118_v28 = vpack.c.bf16 %v2024_v24, %v2024_v24  ;;  %2115 = vrot.lane.b32.xlu0 %v2024_v24, %s3836_s14  ;;  %v3274_v29 = vpop.f32.mrb[7].mxu1 }
 0xc87   : > { %v2131_v31 = vsel %vm2126_vm8, %v2118_v28, 0 }
 0xc88   : > { %3288 = vmatpush3.bf16.xpose.msra.mxu1 %v2131_v31 }
 0xc89   : > { %2109 = vrot.lane.b32.xlu0 %v1949_v30, %s3836_s14  ;;  %3293 = vmatprep.subr.bf16.mxu1 %v3834_v3 }
 0xc8f   : > { %3290 = vmatmul.mubr.msk.bf16.vlgmr.msra.gmra.mrb[8].mxu1 %vm2126_vm8, %v2112_v34  ;;  %v2352_v34 = vld [vmem:[%s4316_s15] sm:$0x1] }
 0xc90   : > { %3295 = vmatprep.mubr.msk.bf16.mxu1 %vm3835_vm6, %v3834_v3 }
 0xcf7   : > { %v2116_v35 = vpop.permute.xlu0 %2115 }
 0xcf8   : > { %v2119_v36 = vpack.c.bf16 %v2116_v35, %v2116_v35 }
 0xcfa   : > { %v2177_v37 = vsel %vm2126_vm8, %v2119_v36, 0 }
 0xcfb   : > { %3294 = vmatpush3.bf16.xpose.msra.mxu1 %v2177_v37  ;;  %v2110_v38 = vpop.permute.xlu0 %2109 }
 0xcfc   : > { %3305 = vmatprep.subr.bf16.mxu1 %v3834_v3  ;;  %v2113_v39 = vpack.c.bf16 %v2110_v38, %v2110_v38 }
 0xd02   : > { %3296 = vmatmul.mubr.msk.bf16.vlgmr.msra.gmra.mrb[12].mxu1 %vm2126_vm8, %v2113_v39 }
 0xd03   : > { %3307 = vmatprep.mubr.msk.bf16.mxu1 %vm3835_vm6, %v3834_v3 }
 0xd62   : > { %v2167_v40 = vpop.f32.mrb[8].mxu1 }
 0xd63   : > { %v2168_v19 = vadd.f32 %v2167_v40, %v4368_v18  ;;  %v3291_v41 = vpop.f32.mrb[9].mxu1 }
 0xd64   : > { %v2170_v42 = vpop.f32.mrb[10].mxu1 }
 0xd65   : > { %v3292_v43 = vpop.f32.mrb[11].mxu1  ;;  %v2220_v44 = vsel %vm2219_vm9, %v2168_v19, -inf }
 0xd66   : > { %2221 = vmax.xlane.f32.xlu0 %v2220_v44 }
 0xdd5   : > { %v2213_v52 = vpop.f32.mrb[12].mxu1 }
 0xdd6   : > { %v2214_v53 = vadd.f32 %v2213_v52, %v4368_v18  ;;  %v3297_v54 = vpop.f32.mrb[13].mxu1  ;;  %v2421_v52 = vld [vmem:[%s4813_s24] sm:$0x1] }
 0xdd7   : > { %v2216_v55 = vpop.f32.mrb[14].mxu1  ;;  %v2422_v54 = vld [vmem:[%s4814_s7] sm:$0x1] }
 0xdd8   : > { %v3298_v56 = vpop.f32.mrb[15].mxu1  ;;  %v2223_v57 = vsel %vm2219_vm9, %v2214_v53, -inf }
 0xdd9   : > { %2224 = vmax.xlane.f32.xlu1 %v2223_v57 }
 0xdea   : > { %2121 = vrot.lane.b32.xlu1 %v2103_v46, %s3836_s14  ;;  %v3553_v46 = vld [vmem:[%s4353_s3 + $0x10] sm:$0xff]  }
 0xdf3   : > { %v2222_v58 = vpop.xlane.xlu0 %2221 }
 0xdf4   : > { %v2226_v59 = vsub.f32 %v2168_v19, %v2222_v58  ;;  %v3555_v58 = vld [vmem:[%s4336_s22] sm:$0xff]  }
 0xdf6   : > { %v2228_v60 = vmul.f32 1.442695, %v2226_v59  ;;  %v3556_v59 = vld [vmem:[%s4336_s22 + $0x8] sm:$0xff]  }
 0xdf8   : > { %3563 = vpow2.f32 %v2228_v60  ;;  %v3557_v60 = vld [vmem:[%s4336_s22 + $0x10] sm:$0xff]  }
 0xe02   : > { %v3564_v61 = vpop.eup %3563 }
 0xe03   : > { %v2232_v62 = vsel %vm2219_vm9, %v3564_v61, 0.0  ;;  %v2238_v63 = vpack.c.bf16 %v3564_v61, %v3564_v61  ;;  %v3558_v61 = vld [vmem:[%s4336_s22 + $0x18] sm:$0xff]  }
 0xe04   : > { %2233 = vadd.xlane.f32.xlu0 %v2232_v62  ;;  %v3559_v62 = vld [vmem:[%s4336_s22 + $0x20] sm:$0xff]  }
 0xe05   : > { %3302 = vmatmul.mubr.msk.bf16.vlgmr.msra.gmra.mrb[4].mxu0 %vm2240_vm11, %v2238_v63  ;;  %v3560_v63 = vld [vmem:[%s4336_s22 + $0x28] sm:$0xff]  }
 0xe06   : > { %3319 = vmatprep.mubr.msk.bf16.mxu0 %vm3835_vm6, %v3834_v3  ;;  %3312 = vmatpush3.bf16.msra.mxu0 %v3547_v9 }
 0xe07   : > { %3313 = vmatprep.subr.bf16.mxu0 %v3834_v3 }
 0xe0a   : > { %3314 = vmatpush3.bf16.msra.mxu0 %v3548_v10 }
 0xe0b   : > { %3315 = vmatprep.subr.bf16.mxu0 %v3834_v3 }
 0xe0e   : > { %3316 = vmatpush3.bf16.msra.mxu0 %v3549_v11 }
 0xe0f   : > { %3317 = vmatprep.subr.bf16.mxu0 %v3834_v3 }
 0xe12   : > { %3318 = vmatpush3.bf16.msra.mxu0 %v3550_v20 }
 0xe13   : > { %3335 = vmatprep.subr.bf16.mxu0 %v3834_v3 }
 0xe66   : > { %v2225_v18 = vpop.xlane.xlu1 %2224 }
 0xe67   : > { %v2227_v0 = vsub.f32 %v2214_v53, %v2225_v18  ;;  %v3561_v18 = vld [vmem:[%s4336_s22 + $0x30] sm:$0xff]  }
 0xe69   : > { %v2230_v1 = vmul.f32 1.442695, %v2227_v0  ;;  %v3562_v0 = vld [vmem:[%s4336_s22 + $0x38] sm:$0xff]  }
 0xe6a   : > { %v2122_v2 = vpop.permute.xlu1 %2121 }
 0xe6b   : > { %3565 = vpow2.f32 %v2230_v1  ;;  %v2125_v4 = vpack.c.bf16 %v2122_v2, %v2122_v2  ;;  %v2449_v1 = vld [vmem:[%s4815_s21] sm:$0x1] }
 0xe6d   : > { %v2292_v5 = vsel %vm2244_vm10, %v2125_v4, 0 }
 0xe6e   : > { %3306 = vmatpush3.bf16.msra.mxu1 %v2292_v5 }
 0xe6f   : > { %3323 = vmatprep.subr.bf16.mxu1 %v3834_v3 }
 0xe75   : > { %v3566_v6 = vpop.eup %3565 }
 0xe76   : > { %v2235_v7 = vsel %vm2219_vm9, %v3566_v6, 0.0  ;;  %v2239_v8 = vpack.c.bf16 %v3566_v6, %v3566_v6 }
 0xe77   : > { %2236 = vadd.xlane.f32.xlu1 %v2235_v7 }
 0xe78   : > { %3308 = vmatmul.mubr.msk.bf16.vlgmr.msra.gmra.mrb[16].mxu1 %vm2240_vm11, %v2239_v8 }
 0xe79   : > { %3331 = vmatprep.mubr.msk.bf16.mxu1 %vm3835_vm6, %v3834_v3  ;;  %3324 = vmatpush3.bf16.msra.mxu1 %v3551_v45 }
 0xe7a   : > { %3325 = vmatprep.subr.bf16.mxu1 %v3834_v3 }
 0xe91   : > { %v2234_v28 = vpop.xlane.xlu0 %2233 }
 0xed8   : > { %v2282_v12 = vpop.f32.mrb[4].mxu0 }
 0xed9   : > { %v3303_v13 = vpop.f32.mrb[5].mxu0 }
 0xeda   : > { %v2285_v14 = vpop.f32.mrb[6].mxu0 }
 0xedb   : > { %v3304_v15 = vpop.f32.mrb[7].mxu0 }
 0xf04   : > { %v2237_v16 = vpop.xlane.xlu1 %2236 }
 0xf05   : > { %3567 = vrcp.f32 %v2237_v16 }
 0xf06   : > { %3569 = vrcp.f32 %v2234_v28 }
 0xf0f   : > { %v3568_v22 = vpop.eup %3567 }
 0xf10   : > { %v3570_v29 = vpop.eup %3569 }
 0xf11   : > { %v2336_v30 = vmul.f32 %v3570_v29, %v2282_v12 }
 0xf4b   : > { %v2328_v23 = vpop.f32.mrb[16].mxu1 }
 0xf4c   : > { %v2337_v24 = vmul.f32 %v3568_v22, %v2328_v23  ;;  %v3309_v25 = vpop.f32.mrb[17].mxu1 }
 0xf4d   : > { %v2331_v26 = vpop.f32.mrb[18].mxu1 }
 0xf4e   : > { %2339 = vrot.lane.b32.xlu0 %v2337_v24, %s3837_s17  ;;  %v3310_v27 = vpop.f32.mrb[19].mxu1 }
 0xfc0   : > { %v2340_v31 = vpop.permute.xlu0 %2339 }
 0xfc1   : > { %v2342_v32 = vsel %vm2126_vm8, %v2336_v30, %v2340_v31 }
 0xfc2   : > { %v2343_v33 = vpack.c.bf16 %v2342_v32, %v2342_v32 }
 0xfc4   : > { %3320 = vmatmul.mubr.msk.bf16.vlgmr.msra.gmra.mrb[8].mxu0 %vm1905_vm7, %v2343_v33 }
 0xfc5   : > { %3351 = vmatprep.mubr.msk.bf16.mxu0 %vm3835_vm6, %v3834_v3  ;;  %3336 = vmatpush3.bf16.msra.mxu0 %v3555_v58 }
 0xfc6   : > { %3337 = vmatprep.subr.bf16.mxu0 %v3834_v3 }
 0xfc9   : > { %3338 = vmatpush3.bf16.msra.mxu0 %v3556_v59 }
 0xfca   : > { %3339 = vmatprep.subr.bf16.mxu0 %v3834_v3 }
 0xfcd   : > { %3340 = vmatpush3.bf16.msra.mxu0 %v3557_v60 }
 0xfce   : > { %3341 = vmatprep.subr.bf16.mxu0 %v3834_v3 }
 0xfd1   : > { %3342 = vmatpush3.bf16.msra.mxu0 %v3558_v61 }
 0xfd2   : > { %3343 = vmatprep.subr.bf16.mxu0 %v3834_v3 }
 0xfd5   : > { %3344 = vmatpush3.bf16.msra.mxu0 %v3559_v62 }
 0xfd6   : > { %3345 = vmatprep.subr.bf16.mxu0 %v3834_v3 }
 0xfd9   : > { %3346 = vmatpush3.bf16.msra.mxu0 %v3560_v63 }
 0xfda   : > { %3347 = vmatprep.subr.bf16.mxu0 %v3834_v3 }
 0xfdd   : > { %3348 = vmatpush3.bf16.msra.mxu0 %v3561_v18 }
 0xfde   : > { %3349 = vmatprep.subr.bf16.mxu0 %v3834_v3 }
 0xfe1   : > { %3350 = vmatpush3.bf16.msra.mxu0 %v3562_v0 }
0x1097   : > { %v2414_v35 = vpop.f32.mrb[8].mxu0 }
0x1098   : > { %v2415_v36 = vadd.f32 %v2414_v35, %v2352_v34  ;;  %v3321_v37 = vpop.f32.mrb[9].mxu0 }
0x1099   : > { %v2417_v38 = vpop.f32.mrb[10].mxu0 }
0x109a   : > { %v2420_v39 = vadd.f32 %v2415_v36, %v4361_v17  ;;  %v3322_v40 = vpop.f32.mrb[11].mxu0  ;;  %v3552_v17 = vld [vmem:[%s4353_s3 + $0x8] sm:$0xff]  }
0x109b   : > { %3326 = vmatpush3.bf16.msra.mxu1 %v3552_v17  ;;  %v2633_v38 = vld [vmem:[%s4346_s28] sm:$0x1] }
0x109c   : > { %v2424_v19 = vsel %vm2423_vm12, %v2420_v39, 0.0  ;;  %3327 = vmatprep.subr.bf16.mxu1 %v3834_v3  ;;  %v2634_v40 = vld [vmem:[%s4351_s27] sm:$0x1] }
0x109d   : > { %2425 = vadd.xlane.f32.xlu1 %v2424_v19 }
0x109f   : > { %3328 = vmatpush3.bf16.msra.mxu1 %v3553_v46 }
0x10a0   : > { %3329 = vmatprep.subr.bf16.mxu1 %v3834_v3  ;;  %v2543_v3 = vld [vmem:[%s4341_s16] sm:$0x1] }
0x10a3   : > { %3330 = vmatpush3.bf16.msra.mxu1 %v3554_v47 }
0x112a   : > { %v2426_v41 = vpop.xlane.xlu1 %2425 }
0x112b   : > { %v2428_v42 = vmul.f32 0.015625, %v2426_v41 }
0x112d   : > { %v2429_v43 = vsub.f32 %v2420_v39, %v2428_v42  ;;  %v2654_v42 = vld [vmem:[%s4816_s20] sm:$0x1] }
0x112f   : > { %v2430_v44 = vmul.f32 %v2429_v43, %v2429_v43 }
0x1131   : > { %v2431_v21 = vsel %vm2423_vm12, %v2430_v44, 0.0 }
0x1132   : > { %2432 = vadd.xlane.f32.xlu1 %v2431_v21 }
0x11bf   : > { %v2433_v48 = vpop.xlane.xlu1 %2432 }
0x11c0   : > { %v2434_v49 = vmul.f32 0.015625, %v2433_v48 }
0x11c2   : > { %v2435_v50 = vadd.f32 1e-12, %v2434_v49 }
0x11c4   : > { %3571 = vrsqrt.f32 %v2435_v50 }
0x11ce   : > { %v3572_v51 = vpop.eup %3571 }
0x11cf   : > { %v2437_v53 = vmul.f32 %v3572_v51, %v2429_v43 }
0x11d1   : > { %v2438_v55 = vmul.f32 %v2437_v53, %v2421_v52 }
0x11d3   : > { %v2439_v56 = vadd.f32 %v2438_v55, %v2422_v54 }
0x11d5   : > { %v2440_v57 = vpack.c.bf16 %v2439_v56, %v2439_v56 }
0x11d7   : > { %3332 = vmatmul.mubr.msk.bf16.vlgmr.msra.gmra.mrb[20].mxu1 %vm1905_vm7, %v2440_v57 }
0x12aa   : > { %v2511_v2 = vpop.f32.mrb[20].mxu1 }
0x12ab   : > { %v2512_v4 = vadd.f32 %v2511_v2, %v2449_v1  ;;  %v3333_v5 = vpop.f32.mrb[21].mxu1 }
0x12ac   : > { %v2514_v6 = vpop.f32.mrb[22].mxu1 }
0x12ad   : > { %v2517_v7 = vmul.f32 %v2512_v4, %v2512_v4  ;;  %v3334_v8 = vpop.f32.mrb[23].mxu1 }
0x12af   : > { %v2518_v9 = vmul.f32 %v2517_v7, %v2512_v4 }
0x12b1   : > { %v2519_v10 = vmul.f32 0.044715, %v2518_v9 }
0x12b3   : > { %v2520_v11 = vadd.f32 %v2519_v10, %v2512_v4 }
0x12b5   : > { %v2521_v12 = vmul.f32 0.7978846, %v2520_v11 }
0x12b7   : > { %3573 = vtanh.f32 %v2521_v12 }
0x12c1   : > { %v3574_v13 = vpop.eup %3573 }
0x12c2   : > { %v2523_v14 = vadd.f32 1.0, %v3574_v13 }
0x12c4   : > { %v2524_v15 = vmul.f32 0.5, %v2523_v14 }
0x12c6   : > { %v2525_v16 = vmul.f32 %v2524_v15, %v2512_v4 }
0x12c8   : > { %v2526_v20 = vpack.c.bf16 %v2525_v16, %v2525_v16 }
0x12ca   : > { %3352 = vmatmul.mubr.bf16.vlgmr.msra.gmra.mrb[12].mxu0 %v2526_v20 }
0x139d   : > { %v2626_v22 = vpop.f32.mrb[12].mxu0 }
0x139e   : > { %v2627_v23 = vadd.f32 %v2626_v22, %v2543_v3  ;;  %v3353_v24 = vpop.f32.mrb[13].mxu0 }
0x139f   : > { %v2629_v25 = vpop.f32.mrb[14].mxu0 }
0x13a0   : > { %v3354_v26 = vpop.f32.mrb[15].mxu0  ;;  %v2632_v27 = vadd.f32 %v2627_v23, %v2439_v56 }
0x13a2   : > { %v2635_v28 = vsel %vm2423_vm12, %v2632_v27, 0.0 }
0x13a3   : > { %2636 = vadd.xlane.f32.xlu0 %v2635_v28 }
0x1430   : > { %v2637_v29 = vpop.xlane.xlu0 %2636 }
0x1431   : > { %v2638_v30 = vmul.f32 0.015625, %v2637_v29 }
0x1433   : > { %v2639_v31 = vsub.f32 %v2632_v27, %v2638_v30 }
0x1435   : > { %v2640_v32 = vmul.f32 %v2639_v31, %v2639_v31 }
0x1437   : > { %v2641_v33 = vsel %vm2423_vm12, %v2640_v32, 0.0 }
0x1438   : > { %2642 = vadd.xlane.f32.xlu1 %v2641_v33 }
0x14c5   : > { %v2643_v34 = vpop.xlane.xlu1 %2642 }
0x14c6   : > { %v2644_v35 = vmul.f32 0.015625, %v2643_v34 }
0x14c8   : > { %v2645_v36 = vadd.f32 1e-12, %v2644_v35 }
0x14ca   : > { %3575 = vrsqrt.f32 %v2645_v36 }
0x14d4   : > { %v3576_v37 = vpop.eup %3575 }
0x14d5   : > { %v2647_v39 = vmul.f32 %v3576_v37, %v2639_v31 }
0x14d7   : > { %v2648_v19 = vmul.f32 %v2647_v39, %v2633_v38 }
0x14d9   : > { %v2649_v41 = vadd.f32 %v2648_v19, %v2634_v40 }
0x14db   : > { %v2650_v43 = vpack.c.bf16 %v2649_v41, %v2649_v41 }
0x14dd   : > { %v2655_v44 = vsel %vm2653_vm14, %v2650_v43, %v2654_v42 }
0x14de   : > { %2656 = vst [vmem:[%s4816_s20] sm:$0x1] %v2655_v44 }
0x14df PF: > { %s4817_s0 = sld [smem:[#allocation22_spill]]  ;;  %s4818_s1 = sld [smem:[#allocation14_spill]] }
0x14e0   : > { %s4819_s22 = sld [smem:[#allocation15_spill]]  ;;  %s4820_s23 = sld [smem:[#allocation26_spill]] }
0x14e1   : > { %s4821_s24 = sld [smem:[#allocation16_spill]]  ;;  %s4822_s2 = sld [smem:[#allocation17_spill]] }
0x14e2   : > { %s4823_s25 = sld [smem:[#allocation29_spill]]  ;;  %s4824_s3 = sld [smem:[#allocation20_spill]] }
0x14e3   : > { %s4825_s26 = sld [smem:[#allocation21_spill]]  ;;  %s4826_s27 = sld [smem:[#allocation25_spill]] }
0x14e4   : > { %s4827_s28 = sld [smem:[#allocation28_spill]] }
0x14e5   : > { %s37_s4 = sadd.s32 1, %s4817_s0  }
0x14e6   : > { %p34_p3 = scmp.ge.s32.totalorder %s37_s4, 6  }
0x14e8   :  { %36 = sbr.rel (!%p34_p3) target bundleno = 32 (0x20), region = 229 }
0x14ef   :  { %2674 = vsyncpa [#allocation4], 1 }
0x14f0   :  { %2676 = vsyncpa [#allocation4 + $0x1], 1 }
0x14f1   :  { %2677 = vsyncpa [#allocation6], 1 }
0x14f2   :  { %2678 = vsyncpa [#allocation9], 1 }
0x14f3   :  { %2680 = vsyncpa [#allocation9 + $0x1], 1 }

</bundles_post_ra>
